<compile_context>
chip_gen: v6e
topology: v6e:2x2x1
jax: 0.10.0
libtpu: 0.0.40
codegen_flags: <defaults>
</compile_context>

<pallas_src>
import functools
import math

import jax
import jax.numpy as jnp
from jax.experimental import pallas as pl
from jax.experimental.pallas import tpu as pltpu

# ----- model hyper-parameters (small, consistent with the module's forward) -----
D_MODEL = 32
NHEAD = 4
NUM_LAYERS = 2
DIM_FF = 64
MAX_LEN = 5000
B = 2
T = 8
LN_EPS = 1e-5

VEC_W = 4 * D_MODEL          # lane width of the packed bias/LN slab (32*4 = 128)


# ---------------------------------------------------------------------------
# shared helpers
# ---------------------------------------------------------------------------
def _layernorm(x, w, b):
    mu = jnp.mean(x, axis=-1, keepdims=True)
    var = jnp.mean(jnp.square(x - mu), axis=-1, keepdims=True)
    return (x - mu) * jax.lax.rsqrt(var + LN_EPS) * w + b


# ---------------------------------------------------------------------------
# fused kernel: pos-add + both encoder layers, whole batch, single invocation
# ---------------------------------------------------------------------------
def fused_transformer_kernel(x_ref, pos_ref, attw_ref, ffw_ref, vec_ref, o_ref,
                             *, nhead):
    Bx, Tx, Dx = x_ref.shape
    num_layers = attw_ref.shape[0]
    ff = ffw_ref.shape[-1]
    dh = Dx // nhead
    n = Bx * Tx
    d3 = 3 * Dx

    # learned positional encoding (broadcast over batch), flatten batch into rows
    x = (x_ref[...] + pos_ref[...][None, :, :]).reshape(n, Dx)        # (B*T, D)

    for layer in range(num_layers):                                    # static, unrolled
        # ---- hoist this layer's params out of the packed slabs (static slices) ----
        attw = attw_ref[layer]                     # (D, 4D) = [Wq*scale | Wk | Wv | Wo^T]
        wqkv = attw[:, :d3]                        # (D, 3D)
        wo_t = attw[:, d3:]                        # (D, D)
        ffw = ffw_ref[layer]                       # (D+FF, FF) = [W1^T ; W2^T (lane-padded)]
        w1 = ffw[:Dx, :]                           # (D, FF)
        w2 = ffw[Dx:, :Dx]                         # (FF, D)
        vec = vec_ref[layer]                       # (3, 4D)
        bqkv = vec[0:1, :d3]                       # (1, 3D)  (bq already scaled)
        bo = vec[0:1, d3:d3 + Dx]                  # (1, D)
        ln1w = vec[1:2, 0:Dx]
        ln1b = vec[1:2, Dx:2 * Dx]
        ln2w = vec[1:2, 2 * Dx:3 * Dx]
        ln2b = vec[1:2, 3 * Dx:4 * Dx]
        b1 = vec[2:3, 0:ff]                        # (1, FF)
        b2 = vec[2:3, ff:ff + Dx]                  # (1, D)

        # ---- multi-head self attention: ONE fused QKV matmul ----
        qkv = jnp.dot(x, wqkv, preferred_element_type=jnp.float32) + bqkv   # (B*T, 3D)

        def split_heads(a):                        # (B*T, D) -> (H*B, T, dh), g = h*B + b
            hs = [a[:, h * dh:(h + 1) * dh] for h in range(nhead)]
            return jnp.stack(hs, axis=0).reshape(nhead * Bx, Tx, dh)

        qg = split_heads(qkv[:, 0:Dx])             # 1/sqrt(dh) already folded into Wq/bq
        kg = split_heads(qkv[:, Dx:2 * Dx])
        vg = split_heads(qkv[:, 2 * Dx:3 * Dx])

        s = jnp.einsum("gqd,gkd->gqk", qg, kg,
                       preferred_element_type=jnp.float32)             # (H*B, T, T)
        s = s - jnp.max(s, axis=-1, keepdims=True)
        p = jnp.exp(s)
        p = p * pl.reciprocal(jnp.sum(p, axis=-1, keepdims=True), approx=False)
        og = jnp.einsum("gqk,gkd->gqd", p, vg,
                        preferred_element_type=jnp.float32)            # (H*B, T, dh)

        # back to PyTorch concat layout (B*T, H*dh), then ONE output-projection matmul
        attn = jnp.concatenate(
            [og[h * Bx:(h + 1) * Bx].reshape(n, dh) for h in range(nhead)], axis=-1)
        attn = jnp.dot(attn, wo_t, preferred_element_type=jnp.float32) + bo

        # residual + LayerNorm 1  (dropout == identity in eval mode)
        x = _layernorm(x + attn, ln1w, ln1b)

        # ---- feed forward (ReLU) ----
        h1 = jnp.maximum(jnp.dot(x, w1, preferred_element_type=jnp.float32) + b1, 0.0)
        h2 = jnp.dot(h1, w2, preferred_element_type=jnp.float32) + b2

        # residual + LayerNorm 2
        x = _layernorm(x + h2, ln2w, ln2b)

    o_ref[...] = x.reshape(Bx, Tx, Dx).astype(o_ref.dtype)


# ---------------------------------------------------------------------------
# model-build-time weight packing (runs ONCE, off the per-call hot path)
# ---------------------------------------------------------------------------
def pack_params(layer_params):
    """Repack PyTorch-convention weights into 3 contiguous, lane-dense slabs."""
    dh = D_MODEL // NHEAD
    scale = 1.0 / math.sqrt(dh)
    attn_w, ff_w, vec = [], [], []
    for p in layer_params:
        wqkv_t = p["wqkv"].T                                           # (D, 3D)
        wqkv_t = wqkv_t.at[:, :D_MODEL].multiply(scale)                # fold 1/sqrt(dh) into Wq
        attn_w.append(jnp.concatenate([wqkv_t, p["wo"].T], axis=1))    # (D, 4D) = (32, 128)

        w2_pad = jnp.pad(p["w2"].T, ((0, 0), (0, DIM_FF - D_MODEL)))   # (FF, FF)
        ff_w.append(jnp.concatenate([p["w1"].T, w2_pad], axis=0))      # (D+FF, FF) = (96, 64)

        bqkv = p["bqkv"].at[:D_MODEL].multiply(scale)                  # scale bq as well
        row0 = jnp.concatenate([bqkv, p["bo"]])                                  # (128,)
        row1 = jnp.concatenate([p["ln1w"], p["ln1b"], p["ln2w"], p["ln2b"]])     # (128,)
        row2 = jnp.concatenate(
            [p["b1"], p["b2"], jnp.zeros((VEC_W - DIM_FF - D_MODEL,), jnp.float32)])
        vec.append(jnp.stack([row0, row1, row2]))                      # (3, 128)
    return jnp.stack(attn_w), jnp.stack(ff_w), jnp.stack(vec)


# ---------------------------------------------------------------------------
# hot path: a single grid-less pallas_call; all operands whole-array VMEM-resident
# ---------------------------------------------------------------------------
@jax.jit
def temporal_transformer(x, pos, attn_w, ff_w, vec):
    vmem = pl.BlockSpec(memory_space=pltpu.MemorySpace.VMEM)
    return pl.pallas_call(
        functools.partial(fused_transformer_kernel, nhead=NHEAD),
        out_shape=jax.ShapeDtypeStruct(x.shape, x.dtype),
        in_specs=[vmem] * 5,
        out_specs=vmem,
    )(x, pos, attn_w, ff_w, vec)


# ---------------------------------------------------------------------------
# plain-JAX reference (PyTorch weight convention), high-precision matmuls
# ---------------------------------------------------------------------------
HP = jax.lax.Precision.HIGHEST


def ref_forward(x, pos_table, layer_params):
    x = x + pos_table[:x.shape[1]][None]
    dh = D_MODEL // NHEAD
    for p in layer_params:
        qkv = jnp.dot(x, p["wqkv"].T, precision=HP) + p["bqkv"]        # (B, T, 3D)
        q, k, v = jnp.split(qkv, 3, axis=-1)
        Bx, Tx, Dx = q.shape

        def split_heads(a):
            return a.reshape(Bx, Tx, NHEAD, dh).transpose(0, 2, 1, 3)

        qh, kh, vh = split_heads(q), split_heads(k), split_heads(v)
        s = jnp.einsum("bhqd,bhkd->bhqk", qh, kh, precision=HP) / math.sqrt(dh)
        pm = jax.nn.softmax(s, axis=-1)
        oh = jnp.einsum("bhqk,bhkd->bhqd", pm, vh, precision=HP)
        attn = oh.transpose(0, 2, 1, 3).reshape(Bx, Tx, Dx)
        attn = jnp.dot(attn, p["wo"].T, precision=HP) + p["bo"]
        x = _layernorm(x + attn, p["ln1w"], p["ln1b"])
        h1 = jnp.maximum(jnp.dot(x, p["w1"].T, precision=HP) + p["b1"], 0.0)
        h2 = jnp.dot(h1, p["w2"].T, precision=HP) + p["b2"]
        x = _layernorm(x + h2, p["ln2w"], p["ln2b"])
    return x


# ---------------------------------------------------------------------------
# deterministic parameter init (PyTorch nn.Linear (out, in) convention)
# ---------------------------------------------------------------------------
def init_layer(key):
    ks = jax.random.split(key, 8)
    s = 0.05
    return {
        "wqkv": jax.random.normal(ks[0], (3 * D_MODEL, D_MODEL), jnp.float32) * s,
        "bqkv": jax.random.normal(ks[1], (3 * D_MODEL,), jnp.float32) * s,
        "wo":   jax.random.normal(ks[2], (D_MODEL, D_MODEL), jnp.float32) * s,
        "bo":   jax.random.normal(ks[3], (D_MODEL,), jnp.float32) * s,
        "ln1w": jnp.ones((D_MODEL,), jnp.float32),
        "ln1b": jnp.zeros((D_MODEL,), jnp.float32),
        "w1":   jax.random.normal(ks[4], (DIM_FF, D_MODEL), jnp.float32) * s,
        "b1":   jax.random.normal(ks[5], (DIM_FF,), jnp.float32) * s,
        "w2":   jax.random.normal(ks[6], (D_MODEL, DIM_FF), jnp.float32) * s,
        "b2":   jax.random.normal(ks[7], (D_MODEL,), jnp.float32) * s,
        "ln2w": jnp.ones((D_MODEL,), jnp.float32),
        "ln2b": jnp.zeros((D_MODEL,), jnp.float32),
    }


if __name__ == "__main__":
    key = jax.random.PRNGKey(0)
    kx, kpos, k0, k1 = jax.random.split(key, 4)

    x = jax.random.normal(kx, (B, T, D_MODEL), jnp.float32)
    pos_table = jax.random.normal(kpos, (MAX_LEN, D_MODEL), jnp.float32) * 0.02
    layer_params = tuple(init_layer(k) for k in (k0, k1)[:NUM_LAYERS])

    # ---- model-build time: pack weights & slice positional table ONCE ----
    attn_w, ff_w, vec = pack_params(layer_params)
    pos = pos_table[:T]

    out = jax.block_until_ready(temporal_transformer(x, pos, attn_w, ff_w, vec))
    ref = ref_forward(x, pos_table, layer_params)

    assert out.shape == (B, T, D_MODEL)
    # Tolerance covers possible MXU f32-vs-bf16-pass differences between the Pallas
    # kernel and the XLA reference; real structural bugs would be O(1e-1) after LN.
    assert jnp.allclose(out, ref, atol=5e-3, rtol=5e-3), (
        "mismatch vs reference: max abs diff = %e"
        % float(jnp.max(jnp.abs(out - ref))))

    print("KERNEL_OK")
</pallas_src>

<mosaic_0001>
module attributes {stable_mosaic.version = 11 : i64} {
  func.func @fused_transformer_kernel(%arg0: memref<2x8x32xf32, #tpu.memory_space<vmem>>, %arg1: memref<8x32xf32, #tpu.memory_space<vmem>>, %arg2: memref<2x32x128xf32, #tpu.memory_space<vmem>>, %arg3: memref<2x96x64xf32, #tpu.memory_space<vmem>>, %arg4: memref<2x3x128xf32, #tpu.memory_space<vmem>>, %arg5: memref<2x8x32xf32, #tpu.memory_space<vmem>>) attributes {dimension_semantics = [], scalar_prefetch = 0 : i64, scratch_operands = 0 : i64, tpu.core_type = #tpu.core_type<tc>} {
    %c0 = arith.constant 0 : index
    %c0_0 = arith.constant 0 : index
    %c0_1 = arith.constant 0 : index
    %0 = vector.load %arg0[%c0, %c0_0, %c0_1] : memref<2x8x32xf32, #tpu.memory_space<vmem>>, vector<2x8x32xf32>
    %c0_2 = arith.constant 0 : index
    %c0_3 = arith.constant 0 : index
    %1 = vector.load %arg1[%c0_2, %c0_3] : memref<8x32xf32, #tpu.memory_space<vmem>>, vector<8x32xf32>
    %2 = vector.shape_cast %1 : vector<8x32xf32> to vector<1x8x32xf32>
    %3 = vector.broadcast %2 : vector<1x8x32xf32> to vector<2x8x32xf32>
    %4 = arith.addf %0, %3 : vector<2x8x32xf32>
    %5 = vector.shape_cast %4 : vector<2x8x32xf32> to vector<16x32xf32>
    %c0_4 = arith.constant 0 : index
    %c0_5 = arith.constant 0 : index
    %c0_6 = arith.constant 0 : index
    %6 = vector.load %arg2[%c0_4, %c0_5, %c0_6] : memref<2x32x128xf32, #tpu.memory_space<vmem>>, vector<1x32x128xf32>
    %7 = vector.shape_cast %6 : vector<1x32x128xf32> to vector<32x128xf32>
    %8 = vector.extract_strided_slice %7 {offsets = [0, 0], sizes = [32, 96], strides = [1, 1]} : vector<32x128xf32> to vector<32x96xf32>
    %9 = vector.extract_strided_slice %7 {offsets = [0, 96], sizes = [32, 32], strides = [1, 1]} : vector<32x128xf32> to vector<32x32xf32>
    %c0_7 = arith.constant 0 : index
    %c0_8 = arith.constant 0 : index
    %c0_9 = arith.constant 0 : index
    %10 = vector.load %arg3[%c0_7, %c0_8, %c0_9] : memref<2x96x64xf32, #tpu.memory_space<vmem>>, vector<1x96x64xf32>
    %11 = vector.shape_cast %10 : vector<1x96x64xf32> to vector<96x64xf32>
    %12 = vector.extract_strided_slice %11 {offsets = [0, 0], sizes = [32, 64], strides = [1, 1]} : vector<96x64xf32> to vector<32x64xf32>
    %13 = vector.extract_strided_slice %11 {offsets = [32, 0], sizes = [64, 32], strides = [1, 1]} : vector<96x64xf32> to vector<64x32xf32>
    %c0_10 = arith.constant 0 : index
    %c0_11 = arith.constant 0 : index
    %c0_12 = arith.constant 0 : index
    %14 = vector.load %arg4[%c0_10, %c0_11, %c0_12] : memref<2x3x128xf32, #tpu.memory_space<vmem>>, vector<1x3x128xf32>
    %15 = vector.shape_cast %14 : vector<1x3x128xf32> to vector<3x128xf32>
    %16 = vector.extract_strided_slice %15 {offsets = [0, 0], sizes = [1, 96], strides = [1, 1]} : vector<3x128xf32> to vector<1x96xf32>
    %17 = vector.extract_strided_slice %15 {offsets = [0, 96], sizes = [1, 32], strides = [1, 1]} : vector<3x128xf32> to vector<1x32xf32>
    %18 = vector.extract_strided_slice %15 {offsets = [1, 0], sizes = [1, 32], strides = [1, 1]} : vector<3x128xf32> to vector<1x32xf32>
    %19 = vector.extract_strided_slice %15 {offsets = [1, 32], sizes = [1, 32], strides = [1, 1]} : vector<3x128xf32> to vector<1x32xf32>
    %20 = vector.extract_strided_slice %15 {offsets = [1, 64], sizes = [1, 32], strides = [1, 1]} : vector<3x128xf32> to vector<1x32xf32>
    %21 = vector.extract_strided_slice %15 {offsets = [1, 96], sizes = [1, 32], strides = [1, 1]} : vector<3x128xf32> to vector<1x32xf32>
    %22 = vector.extract_strided_slice %15 {offsets = [2, 0], sizes = [1, 64], strides = [1, 1]} : vector<3x128xf32> to vector<1x64xf32>
    %23 = vector.extract_strided_slice %15 {offsets = [2, 64], sizes = [1, 32], strides = [1, 1]} : vector<3x128xf32> to vector<1x32xf32>
    %cst = arith.constant dense<0.000000e+00> : vector<16x96xf32>
    %24 = tpu.matmul %5, %8, %cst {dimension_numbers = #tpu.dot_dimension_numbers<[1], [0], [0], [1], [0, 0, 1, 1], [], []>} : vector<16x32xf32>, vector<32x96xf32>, vector<16x96xf32> -> vector<16x96xf32>
    %25 = vector.broadcast %16 : vector<1x96xf32> to vector<16x96xf32>
    %26 = arith.addf %24, %25 : vector<16x96xf32>
    %27 = vector.extract_strided_slice %26 {offsets = [0, 0], sizes = [16, 32], strides = [1, 1]} : vector<16x96xf32> to vector<16x32xf32>
    %28 = vector.extract_strided_slice %27 {offsets = [0, 0], sizes = [16, 8], strides = [1, 1]} : vector<16x32xf32> to vector<16x8xf32>
    %29 = vector.extract_strided_slice %27 {offsets = [0, 8], sizes = [16, 8], strides = [1, 1]} : vector<16x32xf32> to vector<16x8xf32>
    %30 = vector.extract_strided_slice %27 {offsets = [0, 16], sizes = [16, 8], strides = [1, 1]} : vector<16x32xf32> to vector<16x8xf32>
    %31 = vector.extract_strided_slice %27 {offsets = [0, 24], sizes = [16, 8], strides = [1, 1]} : vector<16x32xf32> to vector<16x8xf32>
    %32 = vector.shape_cast %28 : vector<16x8xf32> to vector<1x16x8xf32>
    %33 = vector.shape_cast %29 : vector<16x8xf32> to vector<1x16x8xf32>
    %34 = vector.shape_cast %30 : vector<16x8xf32> to vector<1x16x8xf32>
    %35 = vector.shape_cast %31 : vector<16x8xf32> to vector<1x16x8xf32>
    %36 = tpu.concatenate %32, %33, %34, %35 in 0 : vector<1x16x8xf32>, vector<1x16x8xf32>, vector<1x16x8xf32>, vector<1x16x8xf32> -> vector<4x16x8xf32>
    %37 = vector.shape_cast %36 : vector<4x16x8xf32> to vector<8x8x8xf32>
    %38 = vector.extract_strided_slice %26 {offsets = [0, 32], sizes = [16, 32], strides = [1, 1]} : vector<16x96xf32> to vector<16x32xf32>
    %39 = vector.extract_strided_slice %38 {offsets = [0, 0], sizes = [16, 8], strides = [1, 1]} : vector<16x32xf32> to vector<16x8xf32>
    %40 = vector.extract_strided_slice %38 {offsets = [0, 8], sizes = [16, 8], strides = [1, 1]} : vector<16x32xf32> to vector<16x8xf32>
    %41 = vector.extract_strided_slice %38 {offsets = [0, 16], sizes = [16, 8], strides = [1, 1]} : vector<16x32xf32> to vector<16x8xf32>
    %42 = vector.extract_strided_slice %38 {offsets = [0, 24], sizes = [16, 8], strides = [1, 1]} : vector<16x32xf32> to vector<16x8xf32>
    %43 = vector.shape_cast %39 : vector<16x8xf32> to vector<1x16x8xf32>
    %44 = vector.shape_cast %40 : vector<16x8xf32> to vector<1x16x8xf32>
    %45 = vector.shape_cast %41 : vector<16x8xf32> to vector<1x16x8xf32>
    %46 = vector.shape_cast %42 : vector<16x8xf32> to vector<1x16x8xf32>
    %47 = tpu.concatenate %43, %44, %45, %46 in 0 : vector<1x16x8xf32>, vector<1x16x8xf32>, vector<1x16x8xf32>, vector<1x16x8xf32> -> vector<4x16x8xf32>
    %48 = vector.shape_cast %47 : vector<4x16x8xf32> to vector<8x8x8xf32>
    %49 = vector.extract_strided_slice %26 {offsets = [0, 64], sizes = [16, 32], strides = [1, 1]} : vector<16x96xf32> to vector<16x32xf32>
    %50 = vector.extract_strided_slice %49 {offsets = [0, 0], sizes = [16, 8], strides = [1, 1]} : vector<16x32xf32> to vector<16x8xf32>
    %51 = vector.extract_strided_slice %49 {offsets = [0, 8], sizes = [16, 8], strides = [1, 1]} : vector<16x32xf32> to vector<16x8xf32>
    %52 = vector.extract_strided_slice %49 {offsets = [0, 16], sizes = [16, 8], strides = [1, 1]} : vector<16x32xf32> to vector<16x8xf32>
    %53 = vector.extract_strided_slice %49 {offsets = [0, 24], sizes = [16, 8], strides = [1, 1]} : vector<16x32xf32> to vector<16x8xf32>
    %54 = vector.shape_cast %50 : vector<16x8xf32> to vector<1x16x8xf32>
    %55 = vector.shape_cast %51 : vector<16x8xf32> to vector<1x16x8xf32>
    %56 = vector.shape_cast %52 : vector<16x8xf32> to vector<1x16x8xf32>
    %57 = vector.shape_cast %53 : vector<16x8xf32> to vector<1x16x8xf32>
    %58 = tpu.concatenate %54, %55, %56, %57 in 0 : vector<1x16x8xf32>, vector<1x16x8xf32>, vector<1x16x8xf32>, vector<1x16x8xf32> -> vector<4x16x8xf32>
    %59 = vector.shape_cast %58 : vector<4x16x8xf32> to vector<8x8x8xf32>
    "tpu.trace_start"() <{level = 10 : i32, message = "gqd,gkd->gqk"}> : () -> ()
    %cst_13 = arith.constant dense<0.000000e+00> : vector<8x8x8xf32>
    %60 = tpu.matmul %37, %48, %cst_13 {dimension_numbers = #tpu.dot_dimension_numbers<[2], [2], [1], [1], [0, 0, 0, 1, 1, 1], [0], [0]>} : vector<8x8x8xf32>, vector<8x8x8xf32>, vector<8x8x8xf32> -> vector<8x8x8xf32>
    "tpu.trace_stop"() : () -> ()
    %cst_14 = arith.constant dense<0xFF800000> : vector<8x8xf32>
    %61 = vector.multi_reduction <maximumf>, %60, %cst_14 [2] : vector<8x8x8xf32> to vector<8x8xf32>
    %62 = vector.shape_cast %61 : vector<8x8xf32> to vector<8x8x1xf32>
    %63 = vector.broadcast %62 : vector<8x8x1xf32> to vector<8x8x8xf32>
    %64 = arith.subf %60, %63 : vector<8x8x8xf32>
    %65 = math.exp %64 : vector<8x8x8xf32>
    %cst_15 = arith.constant dense<0.000000e+00> : vector<8x8xf32>
    %66 = vector.multi_reduction <add>, %65, %cst_15 [2] : vector<8x8x8xf32> to vector<8x8xf32>
    %67 = vector.shape_cast %66 : vector<8x8xf32> to vector<8x8x1xf32>
    %68 = tpu.reciprocal %67 : vector<8x8x1xf32> -> vector<8x8x1xf32>
    %69 = vector.broadcast %68 : vector<8x8x1xf32> to vector<8x8x8xf32>
    %70 = arith.mulf %65, %69 : vector<8x8x8xf32>
    "tpu.trace_start"() <{level = 10 : i32, message = "gqk,gkd->gqd"}> : () -> ()
    %cst_16 = arith.constant dense<0.000000e+00> : vector<8x8x8xf32>
    %71 = tpu.matmul %70, %59, %cst_16 {dimension_numbers = #tpu.dot_dimension_numbers<[2], [1], [1], [2], [0, 0, 0, 1, 1, 2], [0], [0]>} : vector<8x8x8xf32>, vector<8x8x8xf32>, vector<8x8x8xf32> -> vector<8x8x8xf32>
    "tpu.trace_stop"() : () -> ()
    %72 = vector.extract_strided_slice %71 {offsets = [0, 0, 0], sizes = [2, 8, 8], strides = [1, 1, 1]} : vector<8x8x8xf32> to vector<2x8x8xf32>
    %73 = vector.shape_cast %72 : vector<2x8x8xf32> to vector<16x8xf32>
    %74 = vector.extract_strided_slice %71 {offsets = [2, 0, 0], sizes = [2, 8, 8], strides = [1, 1, 1]} : vector<8x8x8xf32> to vector<2x8x8xf32>
    %75 = vector.shape_cast %74 : vector<2x8x8xf32> to vector<16x8xf32>
    %76 = vector.extract_strided_slice %71 {offsets = [4, 0, 0], sizes = [2, 8, 8], strides = [1, 1, 1]} : vector<8x8x8xf32> to vector<2x8x8xf32>
    %77 = vector.shape_cast %76 : vector<2x8x8xf32> to vector<16x8xf32>
    %78 = vector.extract_strided_slice %71 {offsets = [6, 0, 0], sizes = [2, 8, 8], strides = [1, 1, 1]} : vector<8x8x8xf32> to vector<2x8x8xf32>
    %79 = vector.shape_cast %78 : vector<2x8x8xf32> to vector<16x8xf32>
    %80 = tpu.concatenate %73, %75, %77, %79 in 1 : vector<16x8xf32>, vector<16x8xf32>, vector<16x8xf32>, vector<16x8xf32> -> vector<16x32xf32>
    %cst_17 = arith.constant dense<0.000000e+00> : vector<16x32xf32>
    %81 = tpu.matmul %80, %9, %cst_17 {dimension_numbers = #tpu.dot_dimension_numbers<[1], [0], [0], [1], [0, 0, 1, 1], [], []>} : vector<16x32xf32>, vector<32x32xf32>, vector<16x32xf32> -> vector<16x32xf32>
    %82 = vector.broadcast %17 : vector<1x32xf32> to vector<16x32xf32>
    %83 = arith.addf %81, %82 : vector<16x32xf32>
    %84 = arith.addf %5, %83 : vector<16x32xf32>
    %cst_18 = arith.constant dense<0.000000e+00> : vector<16xf32>
    %85 = vector.multi_reduction <add>, %84, %cst_18 [1] : vector<16x32xf32> to vector<16xf32>
    %86 = vector.shape_cast %85 : vector<16xf32> to vector<16x1xf32>
    %cst_19 = arith.constant 3.200000e+01 : f32
    %87 = vector.broadcast %cst_19 : f32 to vector<16x1xf32>
    %88 = arith.divf %86, %87 : vector<16x1xf32>
    %89 = vector.broadcast %88 : vector<16x1xf32> to vector<16x32xf32>
    %90 = arith.subf %84, %89 : vector<16x32xf32>
    %91 = arith.mulf %90, %90 : vector<16x32xf32>
    %cst_20 = arith.constant dense<0.000000e+00> : vector<16xf32>
    %92 = vector.multi_reduction <add>, %91, %cst_20 [1] : vector<16x32xf32> to vector<16xf32>
    %93 = vector.shape_cast %92 : vector<16xf32> to vector<16x1xf32>
    %cst_21 = arith.constant 3.200000e+01 : f32
    %94 = vector.broadcast %cst_21 : f32 to vector<16x1xf32>
    %95 = arith.divf %93, %94 : vector<16x1xf32>
    %96 = vector.broadcast %88 : vector<16x1xf32> to vector<16x32xf32>
    %97 = arith.subf %84, %96 : vector<16x32xf32>
    %cst_22 = arith.constant 9.99999974E-6 : f32
    %98 = vector.broadcast %cst_22 : f32 to vector<16x1xf32>
    %99 = arith.addf %95, %98 : vector<16x1xf32>
    %100 = math.rsqrt %99 : vector<16x1xf32>
    %101 = vector.broadcast %100 : vector<16x1xf32> to vector<16x32xf32>
    %102 = arith.mulf %97, %101 : vector<16x32xf32>
    %103 = vector.broadcast %18 : vector<1x32xf32> to vector<16x32xf32>
    %104 = arith.mulf %102, %103 : vector<16x32xf32>
    %105 = vector.broadcast %19 : vector<1x32xf32> to vector<16x32xf32>
    %106 = arith.addf %104, %105 : vector<16x32xf32>
    %cst_23 = arith.constant dense<0.000000e+00> : vector<16x64xf32>
    %107 = tpu.matmul %106, %12, %cst_23 {dimension_numbers = #tpu.dot_dimension_numbers<[1], [0], [0], [1], [0, 0, 1, 1], [], []>} : vector<16x32xf32>, vector<32x64xf32>, vector<16x64xf32> -> vector<16x64xf32>
    %108 = vector.broadcast %22 : vector<1x64xf32> to vector<16x64xf32>
    %109 = arith.addf %107, %108 : vector<16x64xf32>
    %cst_24 = arith.constant 0.000000e+00 : f32
    %110 = vector.broadcast %cst_24 : f32 to vector<16x64xf32>
    %111 = arith.maximumf %109, %110 : vector<16x64xf32>
    %cst_25 = arith.constant dense<0.000000e+00> : vector<16x32xf32>
    %112 = tpu.matmul %111, %13, %cst_25 {dimension_numbers = #tpu.dot_dimension_numbers<[1], [0], [0], [1], [0, 0, 1, 1], [], []>} : vector<16x64xf32>, vector<64x32xf32>, vector<16x32xf32> -> vector<16x32xf32>
    %113 = vector.broadcast %23 : vector<1x32xf32> to vector<16x32xf32>
    %114 = arith.addf %112, %113 : vector<16x32xf32>
    %115 = arith.addf %106, %114 : vector<16x32xf32>
    %cst_26 = arith.constant dense<0.000000e+00> : vector<16xf32>
    %116 = vector.multi_reduction <add>, %115, %cst_26 [1] : vector<16x32xf32> to vector<16xf32>
    %117 = vector.shape_cast %116 : vector<16xf32> to vector<16x1xf32>
    %cst_27 = arith.constant 3.200000e+01 : f32
    %118 = vector.broadcast %cst_27 : f32 to vector<16x1xf32>
    %119 = arith.divf %117, %118 : vector<16x1xf32>
    %120 = vector.broadcast %119 : vector<16x1xf32> to vector<16x32xf32>
    %121 = arith.subf %115, %120 : vector<16x32xf32>
    %122 = arith.mulf %121, %121 : vector<16x32xf32>
    %cst_28 = arith.constant dense<0.000000e+00> : vector<16xf32>
    %123 = vector.multi_reduction <add>, %122, %cst_28 [1] : vector<16x32xf32> to vector<16xf32>
    %124 = vector.shape_cast %123 : vector<16xf32> to vector<16x1xf32>
    %cst_29 = arith.constant 3.200000e+01 : f32
    %125 = vector.broadcast %cst_29 : f32 to vector<16x1xf32>
    %126 = arith.divf %124, %125 : vector<16x1xf32>
    %127 = vector.broadcast %119 : vector<16x1xf32> to vector<16x32xf32>
    %128 = arith.subf %115, %127 : vector<16x32xf32>
    %cst_30 = arith.constant 9.99999974E-6 : f32
    %129 = vector.broadcast %cst_30 : f32 to vector<16x1xf32>
    %130 = arith.addf %126, %129 : vector<16x1xf32>
    %131 = math.rsqrt %130 : vector<16x1xf32>
    %132 = vector.broadcast %131 : vector<16x1xf32> to vector<16x32xf32>
    %133 = arith.mulf %128, %132 : vector<16x32xf32>
    %134 = vector.broadcast %20 : vector<1x32xf32> to vector<16x32xf32>
    %135 = arith.mulf %133, %134 : vector<16x32xf32>
    %136 = vector.broadcast %21 : vector<1x32xf32> to vector<16x32xf32>
    %137 = arith.addf %135, %136 : vector<16x32xf32>
    %c1 = arith.constant 1 : index
    %c0_31 = arith.constant 0 : index
    %c0_32 = arith.constant 0 : index
    %138 = vector.load %arg2[%c1, %c0_31, %c0_32] : memref<2x32x128xf32, #tpu.memory_space<vmem>>, vector<1x32x128xf32>
    %139 = vector.shape_cast %138 : vector<1x32x128xf32> to vector<32x128xf32>
    %140 = vector.extract_strided_slice %139 {offsets = [0, 0], sizes = [32, 96], strides = [1, 1]} : vector<32x128xf32> to vector<32x96xf32>
    %141 = vector.extract_strided_slice %139 {offsets = [0, 96], sizes = [32, 32], strides = [1, 1]} : vector<32x128xf32> to vector<32x32xf32>
    %c1_33 = arith.constant 1 : index
    %c0_34 = arith.constant 0 : index
    %c0_35 = arith.constant 0 : index
    %142 = vector.load %arg3[%c1_33, %c0_34, %c0_35] : memref<2x96x64xf32, #tpu.memory_space<vmem>>, vector<1x96x64xf32>
    %143 = vector.shape_cast %142 : vector<1x96x64xf32> to vector<96x64xf32>
    %144 = vector.extract_strided_slice %143 {offsets = [0, 0], sizes = [32, 64], strides = [1, 1]} : vector<96x64xf32> to vector<32x64xf32>
    %145 = vector.extract_strided_slice %143 {offsets = [32, 0], sizes = [64, 32], strides = [1, 1]} : vector<96x64xf32> to vector<64x32xf32>
    %c1_36 = arith.constant 1 : index
    %c0_37 = arith.constant 0 : index
    %c0_38 = arith.constant 0 : index
    %146 = vector.load %arg4[%c1_36, %c0_37, %c0_38] : memref<2x3x128xf32, #tpu.memory_space<vmem>>, vector<1x3x128xf32>
    %147 = vector.shape_cast %146 : vector<1x3x128xf32> to vector<3x128xf32>
    %148 = vector.extract_strided_slice %147 {offsets = [0, 0], sizes = [1, 96], strides = [1, 1]} : vector<3x128xf32> to vector<1x96xf32>
    %149 = vector.extract_strided_slice %147 {offsets = [0, 96], sizes = [1, 32], strides = [1, 1]} : vector<3x128xf32> to vector<1x32xf32>
    %150 = vector.extract_strided_slice %147 {offsets = [1, 0], sizes = [1, 32], strides = [1, 1]} : vector<3x128xf32> to vector<1x32xf32>
    %151 = vector.extract_strided_slice %147 {offsets = [1, 32], sizes = [1, 32], strides = [1, 1]} : vector<3x128xf32> to vector<1x32xf32>
    %152 = vector.extract_strided_slice %147 {offsets = [1, 64], sizes = [1, 32], strides = [1, 1]} : vector<3x128xf32> to vector<1x32xf32>
    %153 = vector.extract_strided_slice %147 {offsets = [1, 96], sizes = [1, 32], strides = [1, 1]} : vector<3x128xf32> to vector<1x32xf32>
    %154 = vector.extract_strided_slice %147 {offsets = [2, 0], sizes = [1, 64], strides = [1, 1]} : vector<3x128xf32> to vector<1x64xf32>
    %155 = vector.extract_strided_slice %147 {offsets = [2, 64], sizes = [1, 32], strides = [1, 1]} : vector<3x128xf32> to vector<1x32xf32>
    %cst_39 = arith.constant dense<0.000000e+00> : vector<16x96xf32>
    %156 = tpu.matmul %137, %140, %cst_39 {dimension_numbers = #tpu.dot_dimension_numbers<[1], [0], [0], [1], [0, 0, 1, 1], [], []>} : vector<16x32xf32>, vector<32x96xf32>, vector<16x96xf32> -> vector<16x96xf32>
    %157 = vector.broadcast %148 : vector<1x96xf32> to vector<16x96xf32>
    %158 = arith.addf %156, %157 : vector<16x96xf32>
    %159 = vector.extract_strided_slice %158 {offsets = [0, 0], sizes = [16, 32], strides = [1, 1]} : vector<16x96xf32> to vector<16x32xf32>
    %160 = vector.extract_strided_slice %159 {offsets = [0, 0], sizes = [16, 8], strides = [1, 1]} : vector<16x32xf32> to vector<16x8xf32>
    %161 = vector.extract_strided_slice %159 {offsets = [0, 8], sizes = [16, 8], strides = [1, 1]} : vector<16x32xf32> to vector<16x8xf32>
    %162 = vector.extract_strided_slice %159 {offsets = [0, 16], sizes = [16, 8], strides = [1, 1]} : vector<16x32xf32> to vector<16x8xf32>
    %163 = vector.extract_strided_slice %159 {offsets = [0, 24], sizes = [16, 8], strides = [1, 1]} : vector<16x32xf32> to vector<16x8xf32>
    %164 = vector.shape_cast %160 : vector<16x8xf32> to vector<1x16x8xf32>
    %165 = vector.shape_cast %161 : vector<16x8xf32> to vector<1x16x8xf32>
    %166 = vector.shape_cast %162 : vector<16x8xf32> to vector<1x16x8xf32>
    %167 = vector.shape_cast %163 : vector<16x8xf32> to vector<1x16x8xf32>
    %168 = tpu.concatenate %164, %165, %166, %167 in 0 : vector<1x16x8xf32>, vector<1x16x8xf32>, vector<1x16x8xf32>, vector<1x16x8xf32> -> vector<4x16x8xf32>
    %169 = vector.shape_cast %168 : vector<4x16x8xf32> to vector<8x8x8xf32>
    %170 = vector.extract_strided_slice %158 {offsets = [0, 32], sizes = [16, 32], strides = [1, 1]} : vector<16x96xf32> to vector<16x32xf32>
    %171 = vector.extract_strided_slice %170 {offsets = [0, 0], sizes = [16, 8], strides = [1, 1]} : vector<16x32xf32> to vector<16x8xf32>
    %172 = vector.extract_strided_slice %170 {offsets = [0, 8], sizes = [16, 8], strides = [1, 1]} : vector<16x32xf32> to vector<16x8xf32>
    %173 = vector.extract_strided_slice %170 {offsets = [0, 16], sizes = [16, 8], strides = [1, 1]} : vector<16x32xf32> to vector<16x8xf32>
    %174 = vector.extract_strided_slice %170 {offsets = [0, 24], sizes = [16, 8], strides = [1, 1]} : vector<16x32xf32> to vector<16x8xf32>
    %175 = vector.shape_cast %171 : vector<16x8xf32> to vector<1x16x8xf32>
    %176 = vector.shape_cast %172 : vector<16x8xf32> to vector<1x16x8xf32>
    %177 = vector.shape_cast %173 : vector<16x8xf32> to vector<1x16x8xf32>
    %178 = vector.shape_cast %174 : vector<16x8xf32> to vector<1x16x8xf32>
    %179 = tpu.concatenate %175, %176, %177, %178 in 0 : vector<1x16x8xf32>, vector<1x16x8xf32>, vector<1x16x8xf32>, vector<1x16x8xf32> -> vector<4x16x8xf32>
    %180 = vector.shape_cast %179 : vector<4x16x8xf32> to vector<8x8x8xf32>
    %181 = vector.extract_strided_slice %158 {offsets = [0, 64], sizes = [16, 32], strides = [1, 1]} : vector<16x96xf32> to vector<16x32xf32>
    %182 = vector.extract_strided_slice %181 {offsets = [0, 0], sizes = [16, 8], strides = [1, 1]} : vector<16x32xf32> to vector<16x8xf32>
    %183 = vector.extract_strided_slice %181 {offsets = [0, 8], sizes = [16, 8], strides = [1, 1]} : vector<16x32xf32> to vector<16x8xf32>
    %184 = vector.extract_strided_slice %181 {offsets = [0, 16], sizes = [16, 8], strides = [1, 1]} : vector<16x32xf32> to vector<16x8xf32>
    %185 = vector.extract_strided_slice %181 {offsets = [0, 24], sizes = [16, 8], strides = [1, 1]} : vector<16x32xf32> to vector<16x8xf32>
    %186 = vector.shape_cast %182 : vector<16x8xf32> to vector<1x16x8xf32>
    %187 = vector.shape_cast %183 : vector<16x8xf32> to vector<1x16x8xf32>
    %188 = vector.shape_cast %184 : vector<16x8xf32> to vector<1x16x8xf32>
    %189 = vector.shape_cast %185 : vector<16x8xf32> to vector<1x16x8xf32>
    %190 = tpu.concatenate %186, %187, %188, %189 in 0 : vector<1x16x8xf32>, vector<1x16x8xf32>, vector<1x16x8xf32>, vector<1x16x8xf32> -> vector<4x16x8xf32>
    %191 = vector.shape_cast %190 : vector<4x16x8xf32> to vector<8x8x8xf32>
    "tpu.trace_start"() <{level = 10 : i32, message = "gqd,gkd->gqk"}> : () -> ()
    %cst_40 = arith.constant dense<0.000000e+00> : vector<8x8x8xf32>
    %192 = tpu.matmul %169, %180, %cst_40 {dimension_numbers = #tpu.dot_dimension_numbers<[2], [2], [1], [1], [0, 0, 0, 1, 1, 1], [0], [0]>} : vector<8x8x8xf32>, vector<8x8x8xf32>, vector<8x8x8xf32> -> vector<8x8x8xf32>
    "tpu.trace_stop"() : () -> ()
    %cst_41 = arith.constant dense<0xFF800000> : vector<8x8xf32>
    %193 = vector.multi_reduction <maximumf>, %192, %cst_41 [2] : vector<8x8x8xf32> to vector<8x8xf32>
    %194 = vector.shape_cast %193 : vector<8x8xf32> to vector<8x8x1xf32>
    %195 = vector.broadcast %194 : vector<8x8x1xf32> to vector<8x8x8xf32>
    %196 = arith.subf %192, %195 : vector<8x8x8xf32>
    %197 = math.exp %196 : vector<8x8x8xf32>
    %cst_42 = arith.constant dense<0.000000e+00> : vector<8x8xf32>
    %198 = vector.multi_reduction <add>, %197, %cst_42 [2] : vector<8x8x8xf32> to vector<8x8xf32>
    %199 = vector.shape_cast %198 : vector<8x8xf32> to vector<8x8x1xf32>
    %200 = tpu.reciprocal %199 : vector<8x8x1xf32> -> vector<8x8x1xf32>
    %201 = vector.broadcast %200 : vector<8x8x1xf32> to vector<8x8x8xf32>
    %202 = arith.mulf %197, %201 : vector<8x8x8xf32>
    "tpu.trace_start"() <{level = 10 : i32, message = "gqk,gkd->gqd"}> : () -> ()
    %cst_43 = arith.constant dense<0.000000e+00> : vector<8x8x8xf32>
    %203 = tpu.matmul %202, %191, %cst_43 {dimension_numbers = #tpu.dot_dimension_numbers<[2], [1], [1], [2], [0, 0, 0, 1, 1, 2], [0], [0]>} : vector<8x8x8xf32>, vector<8x8x8xf32>, vector<8x8x8xf32> -> vector<8x8x8xf32>
    "tpu.trace_stop"() : () -> ()
    %204 = vector.extract_strided_slice %203 {offsets = [0, 0, 0], sizes = [2, 8, 8], strides = [1, 1, 1]} : vector<8x8x8xf32> to vector<2x8x8xf32>
    %205 = vector.shape_cast %204 : vector<2x8x8xf32> to vector<16x8xf32>
    %206 = vector.extract_strided_slice %203 {offsets = [2, 0, 0], sizes = [2, 8, 8], strides = [1, 1, 1]} : vector<8x8x8xf32> to vector<2x8x8xf32>
    %207 = vector.shape_cast %206 : vector<2x8x8xf32> to vector<16x8xf32>
    %208 = vector.extract_strided_slice %203 {offsets = [4, 0, 0], sizes = [2, 8, 8], strides = [1, 1, 1]} : vector<8x8x8xf32> to vector<2x8x8xf32>
    %209 = vector.shape_cast %208 : vector<2x8x8xf32> to vector<16x8xf32>
    %210 = vector.extract_strided_slice %203 {offsets = [6, 0, 0], sizes = [2, 8, 8], strides = [1, 1, 1]} : vector<8x8x8xf32> to vector<2x8x8xf32>
    %211 = vector.shape_cast %210 : vector<2x8x8xf32> to vector<16x8xf32>
    %212 = tpu.concatenate %205, %207, %209, %211 in 1 : vector<16x8xf32>, vector<16x8xf32>, vector<16x8xf32>, vector<16x8xf32> -> vector<16x32xf32>
    %cst_44 = arith.constant dense<0.000000e+00> : vector<16x32xf32>
    %213 = tpu.matmul %212, %141, %cst_44 {dimension_numbers = #tpu.dot_dimension_numbers<[1], [0], [0], [1], [0, 0, 1, 1], [], []>} : vector<16x32xf32>, vector<32x32xf32>, vector<16x32xf32> -> vector<16x32xf32>
    %214 = vector.broadcast %149 : vector<1x32xf32> to vector<16x32xf32>
    %215 = arith.addf %213, %214 : vector<16x32xf32>
    %216 = arith.addf %137, %215 : vector<16x32xf32>
    %cst_45 = arith.constant dense<0.000000e+00> : vector<16xf32>
    %217 = vector.multi_reduction <add>, %216, %cst_45 [1] : vector<16x32xf32> to vector<16xf32>
    %218 = vector.shape_cast %217 : vector<16xf32> to vector<16x1xf32>
    %cst_46 = arith.constant 3.200000e+01 : f32
    %219 = vector.broadcast %cst_46 : f32 to vector<16x1xf32>
    %220 = arith.divf %218, %219 : vector<16x1xf32>
    %221 = vector.broadcast %220 : vector<16x1xf32> to vector<16x32xf32>
    %222 = arith.subf %216, %221 : vector<16x32xf32>
    %223 = arith.mulf %222, %222 : vector<16x32xf32>
    %cst_47 = arith.constant dense<0.000000e+00> : vector<16xf32>
    %224 = vector.multi_reduction <add>, %223, %cst_47 [1] : vector<16x32xf32> to vector<16xf32>
    %225 = vector.shape_cast %224 : vector<16xf32> to vector<16x1xf32>
    %cst_48 = arith.constant 3.200000e+01 : f32
    %226 = vector.broadcast %cst_48 : f32 to vector<16x1xf32>
    %227 = arith.divf %225, %226 : vector<16x1xf32>
    %228 = vector.broadcast %220 : vector<16x1xf32> to vector<16x32xf32>
    %229 = arith.subf %216, %228 : vector<16x32xf32>
    %cst_49 = arith.constant 9.99999974E-6 : f32
    %230 = vector.broadcast %cst_49 : f32 to vector<16x1xf32>
    %231 = arith.addf %227, %230 : vector<16x1xf32>
    %232 = math.rsqrt %231 : vector<16x1xf32>
    %233 = vector.broadcast %232 : vector<16x1xf32> to vector<16x32xf32>
    %234 = arith.mulf %229, %233 : vector<16x32xf32>
    %235 = vector.broadcast %150 : vector<1x32xf32> to vector<16x32xf32>
    %236 = arith.mulf %234, %235 : vector<16x32xf32>
    %237 = vector.broadcast %151 : vector<1x32xf32> to vector<16x32xf32>
    %238 = arith.addf %236, %237 : vector<16x32xf32>
    %cst_50 = arith.constant dense<0.000000e+00> : vector<16x64xf32>
    %239 = tpu.matmul %238, %144, %cst_50 {dimension_numbers = #tpu.dot_dimension_numbers<[1], [0], [0], [1], [0, 0, 1, 1], [], []>} : vector<16x32xf32>, vector<32x64xf32>, vector<16x64xf32> -> vector<16x64xf32>
    %240 = vector.broadcast %154 : vector<1x64xf32> to vector<16x64xf32>
    %241 = arith.addf %239, %240 : vector<16x64xf32>
    %cst_51 = arith.constant 0.000000e+00 : f32
    %242 = vector.broadcast %cst_51 : f32 to vector<16x64xf32>
    %243 = arith.maximumf %241, %242 : vector<16x64xf32>
    %cst_52 = arith.constant dense<0.000000e+00> : vector<16x32xf32>
    %244 = tpu.matmul %243, %145, %cst_52 {dimension_numbers = #tpu.dot_dimension_numbers<[1], [0], [0], [1], [0, 0, 1, 1], [], []>} : vector<16x64xf32>, vector<64x32xf32>, vector<16x32xf32> -> vector<16x32xf32>
    %245 = vector.broadcast %155 : vector<1x32xf32> to vector<16x32xf32>
    %246 = arith.addf %244, %245 : vector<16x32xf32>
    %247 = arith.addf %238, %246 : vector<16x32xf32>
    %cst_53 = arith.constant dense<0.000000e+00> : vector<16xf32>
    %248 = vector.multi_reduction <add>, %247, %cst_53 [1] : vector<16x32xf32> to vector<16xf32>
    %249 = vector.shape_cast %248 : vector<16xf32> to vector<16x1xf32>
    %cst_54 = arith.constant 3.200000e+01 : f32
    %250 = vector.broadcast %cst_54 : f32 to vector<16x1xf32>
    %251 = arith.divf %249, %250 : vector<16x1xf32>
    %252 = vector.broadcast %251 : vector<16x1xf32> to vector<16x32xf32>
    %253 = arith.subf %247, %252 : vector<16x32xf32>
    %254 = arith.mulf %253, %253 : vector<16x32xf32>
    %cst_55 = arith.constant dense<0.000000e+00> : vector<16xf32>
    %255 = vector.multi_reduction <add>, %254, %cst_55 [1] : vector<16x32xf32> to vector<16xf32>
    %256 = vector.shape_cast %255 : vector<16xf32> to vector<16x1xf32>
    %cst_56 = arith.constant 3.200000e+01 : f32
    %257 = vector.broadcast %cst_56 : f32 to vector<16x1xf32>
    %258 = arith.divf %256, %257 : vector<16x1xf32>
    %259 = vector.broadcast %251 : vector<16x1xf32> to vector<16x32xf32>
    %260 = arith.subf %247, %259 : vector<16x32xf32>
    %cst_57 = arith.constant 9.99999974E-6 : f32
    %261 = vector.broadcast %cst_57 : f32 to vector<16x1xf32>
    %262 = arith.addf %258, %261 : vector<16x1xf32>
    %263 = math.rsqrt %262 : vector<16x1xf32>
    %264 = vector.broadcast %263 : vector<16x1xf32> to vector<16x32xf32>
    %265 = arith.mulf %260, %264 : vector<16x32xf32>
    %266 = vector.broadcast %152 : vector<1x32xf32> to vector<16x32xf32>
    %267 = arith.mulf %265, %266 : vector<16x32xf32>
    %268 = vector.broadcast %153 : vector<1x32xf32> to vector<16x32xf32>
    %269 = arith.addf %267, %268 : vector<16x32xf32>
    %270 = vector.shape_cast %269 : vector<16x32xf32> to vector<2x8x32xf32>
    %c0_58 = arith.constant 0 : index
    %c0_59 = arith.constant 0 : index
    %c0_60 = arith.constant 0 : index
    %271 = vector.load %arg5[%c0_58, %c0_59, %c0_60] : memref<2x8x32xf32, #tpu.memory_space<vmem>>, vector<2x8x32xf32>
    tpu.vector_store %arg5[%c0_58, %c0_59, %c0_60], %270 {strides = array<i32>} : memref<2x8x32xf32, #tpu.memory_space<vmem>>, vector<2x8x32xf32>,
    return
  }
}

</mosaic_0001>

<bundles_post_ra>
// kernel: temporal_transformer.1
= control target key start
LH: loop header
LB: loop body
LE: loop exit
PB: predicated region body
PF: predicated region fallthrough
CT: control target
= control target key end

     0   :  { %vm47_vm0 = vcmask 261120   ;;  %s4928_s0 = inlined_call_operand.vmem [shape: f32[2,8,32], index: 0, kind: input, shape index: {}]   ;;  %s4929_s1 = inlined_call_operand.vmem [shape: f32[8,32], index: 1, kind: input, shape index: {}]   ;;  %s4930_s2 = inlined_call_operand.vmem [shape: f32[2,32,128], index: 2, kind: input, shape index: {}]   ;;  %s4931_s3 = inlined_call_operand.vmem [shape: f32[2,96,64], index: 3, kind: input, shape index: {}]   ;;  %s4932_s4 = inlined_call_operand.vmem [shape: f32[2,3,128], index: 4, kind: input, shape index: {}]   ;;  %s4933_s5 = inlined_call_operand.hbm [shape: f32[2,8,32], index: 5, kind: output, shape index: {}]  }
   0x1   :  { %v4281_v0 = vld [vmem:[%s4930_s2 + $0x18] sm:$0xff]  ;;  %v4286_v1 = vld [vmem:[%s4930_s2 + $0x10] sm:$0xff]  ;;  %v4292_v2 = vld [vmem:[%s4930_s2 + $0x8] sm:$0xff] }
   0x2   :  { %3856 = vmatprep.subr.mxu1 %v4281_v0  ;;  %v21_v3 = vld [vmem:[%s4928_s0] sm:$0xff]  ;;  %v22_v4 = vld [vmem:[%s4928_s0 + $0x8] sm:$0xff] }
   0x3   :  { %3857 = vmatpush3.msra.mxu1 %v4281_v0  ;;  %v23_v5 = vld [vmem:[%s4929_s1] sm:$0xff] }
   0x4   :  { %10 = vsyncpa [#allocation3], 0  ;;  %3858 = vmatprep.subr.mxu1 %v4286_v1  ;;  %v4305_v6 = vadd.f32 %v23_v5, %v21_v3  ;;  %v4311_v7 = vld [vmem:[%s4930_s2] sm:$0xff]  ;;  %v4314_v8 = vadd.f32 %v23_v5, %v22_v4  ;;  %v43_v9 = vlaneseq  ;;  %v4235_v15 = vmov 0.0   ;;  %s4236_s7 = smov 112   ;;  %s4237_s8 = smov 120  }
   0x5   :  { %3859 = vmatpush3.msra.mxu1 %v4286_v1  ;;  %v4329_v12 = vld [vmem:[%s4932_s4] sm:$0x7]  ;;  %3877 = vmatprep.subr.mxu0 %v4235_v15  ;;  %vm4238_vm1 = vmmov 0   ;;  %s4239_s9 = smov 104   ;;  %s4240_s10 = smov 96   ;;  %vm145_vm2 = vcmask 64512  }
   0x6   :  { %3860 = vmatprep.subr.mxu1 %v4292_v2  ;;  %3864 = vmatprep.mubr.msk.f32.mxu1 %vm47_vm0, %v4305_v6  ;;  %v4323_v10 = vshrl.u32 %v43_v9, 7  ;;  %s4241_s11 = smov 64   ;;  %s4242_s12 = smov 32   ;;  %vm1474_vm3 = vcmask 130048   ;;  %vm1477_vm4 = vcmask 195584   ;;  %vm1713_vm5 = vcmask 523264  }
   0x7   :  { %3861 = vmatpush3.msra.mxu1 %v4292_v2  ;;  %3879 = vmatprep.mubr.msk.f32.mxu0 %vm4238_vm1, %v4235_v15  ;;  %s4243_s13 = smov 16   ;;  %s4244_s14 = smov 8  }
   0x8   :  { %3862 = vmatprep.subr.mxu1 %v4311_v7  ;;  %v45_v11 = vsub.s32 0, %v4323_v10  ;;  %s4245_s15 = smov 24  }
   0x9   :  { %3863 = vmatpush3.msra.mxu1 %v4311_v7 }
   0xa   :  { %3865 = vmatmul.mubr.msk.f32.vlgmr.msra.gmra.mxu1 %vm47_vm0, %v4314_v8  ;;  %v4334_v14 = vrot.slane %v4329_v12, %v45_v11  ;;  %3867 = vmatprep.subr.mxu1 %v4235_v15 }
   0xb   :  { %3869 = vmatprep.mubr.msk.f32.mxu1 %vm4238_vm1, %v4235_v15 }
  0xca   :  { %v3866_v13 = vpop.f32.mrf.mxu1 }
  0xcb   :  { %v4350_v18 = vadd.f32 %v3866_v13, %v4334_v14 }
  0xcc   :  { %v120_v16 = vpop.f32.mrf.mxu1 }
  0xcd   :  { %v4339_v17 = vadd.f32 %v120_v16, %v4334_v14 }
  0xcf   :  { %135 = vrot.lane.b32.xlu1 %v4339_v17, %s4236_s7  ;;  %131 = vrot.lane.b32.xlu0 %v4339_v17, %s4237_s8 }
  0xd3   :  { %137 = vrot.lane.b32.xlu1 %v4350_v18, %s4236_s7  ;;  %133 = vrot.lane.b32.xlu0 %v4350_v18, %s4237_s8 }
  0xd7   :  { %141 = vrot.lane.b32.xlu1 %v4350_v18, %s4239_s9  ;;  %139 = vrot.lane.b32.xlu0 %v4339_v17, %s4239_s9 }
  0xdb   :  { %220 = vrot.lane.b32.xlu1 %v4350_v18, %s4240_s10  ;;  %143 = vrot.lane.b32.xlu0 %v4339_v17, %s4240_s10 }
 0x141   :  { %v4364_v19 = vpop.permute.xlu1 %135  ;;  %v4366_v20 = vpop.permute.xlu0 %131 }
 0x142   :  { %296 = vrot.lane.b32.xlu0 %v4366_v20, %s4240_s10 }
 0x145   :  { %v4370_v21 = vpop.permute.xlu1 %137  ;;  %v4372_v22 = vpop.permute.xlu0 %133 }
 0x146   :  { %448 = vrot.lane.b32.xlu0 %v4364_v19, %s4240_s10  ;;  %372 = vrot.lane.b32.xlu1 %v4372_v22, %s4240_s10 }
 0x149   :  { %v4378_v23 = vpop.permute.xlu0 %139  ;;  %v4384_v24 = vpop.permute.xlu1 %141 }
 0x14a   :  { %524 = vrot.lane.b32.xlu1 %v4370_v21, %s4240_s10  ;;  %600 = vrot.lane.b32.xlu0 %v4378_v23, %s4240_s10 }
 0x14d   :  { %v144_v25 = vpop.permute.xlu0 %143  ;;  %v221_v26 = vpop.permute.xlu1 %220 }
 0x14e   :  { %676 = vrot.lane.b32.xlu1 %v4384_v24, %s4240_s10  ;;  %3868 = vmatpush3.xpose.msk.msra.mxu1 %vm145_vm2, %v144_v25 }
 0x14f   :  { %3872 = vmatprep.subr.mxu1 %v4235_v15 }
 0x151   :  { %3870 = vmatmul.mubr.msk.f32.vlgmr.msra.gmra.mxu1 %vm145_vm2, %v4339_v17 }
 0x152   :  { %3873 = vmatpush3.xpose.msk.msra.mxu1 %vm145_vm2, %v221_v26  ;;  %3874 = vmatprep.mubr.msk.f32.mxu1 %vm4238_vm1, %v4235_v15 }
 0x153   :  { %3882 = vmatprep.subr.mxu1 %v4235_v15 }
 0x155   :  { %3875 = vmatmul.mubr.msk.f32.vlgmr.msra.gmra.mxu1 %vm145_vm2, %v4350_v18 }
 0x156   :  { %3884 = vmatprep.mubr.msk.f32.mxu1 %vm4238_vm1, %v4235_v15 }
 0x1b4   :  { %v297_v27 = vpop.permute.xlu0 %296 }
 0x1b5   :  { %3878 = vmatpush3.xpose.msk.msra.mxu0 %vm145_vm2, %v297_v27 }
 0x1b6   :  { %3887 = vmatprep.subr.mxu0 %v4235_v15 }
 0x1b8   :  { %v373_v28 = vpop.permute.xlu1 %372  ;;  %3880 = vmatmul.mubr.msk.f32.vlgmr.msra.gmra.mxu0 %vm145_vm2, %v4366_v20  ;;  %v449_v29 = vpop.permute.xlu0 %448 }
 0x1b9   :  { %3883 = vmatpush3.xpose.msk.msra.mxu1 %vm145_vm2, %v373_v28  ;;  %3888 = vmatpush3.xpose.msk.msra.mxu0 %vm145_vm2, %v449_v29 }
 0x1ba   :  { %3889 = vmatprep.mubr.msk.f32.mxu0 %vm4238_vm1, %v4235_v15  ;;  %3892 = vmatprep.subr.mxu1 %v4235_v15 }
 0x1bb   :  { %3897 = vmatprep.subr.mxu0 %v4235_v15 }
 0x1bc   :  { %v525_v30 = vpop.permute.xlu1 %524  ;;  %3885 = vmatmul.mubr.msk.f32.vlgmr.msra.gmra.mxu1 %vm145_vm2, %v4372_v22  ;;  %3890 = vmatmul.mubr.msk.f32.vlgmr.msra.gmra.mxu0 %vm145_vm2, %v4364_v19  ;;  %v601_v31 = vpop.permute.xlu0 %600 }
 0x1bd   :  { %3893 = vmatpush3.xpose.msk.msra.mxu1 %vm145_vm2, %v525_v30  ;;  %3898 = vmatpush3.xpose.msk.msra.mxu0 %vm145_vm2, %v601_v31 }
 0x1be   :  { %3894 = vmatprep.mubr.msk.f32.mxu1 %vm4238_vm1, %v4235_v15  ;;  %3899 = vmatprep.mubr.msk.f32.mxu0 %vm4238_vm1, %v4235_v15 }
 0x1bf   :  { %3902 = vmatprep.subr.mxu1 %v4235_v15  ;;  %3907 = vmatprep.subr.mxu0 %v4235_v15 }
 0x1c0   :  { %v677_v32 = vpop.permute.xlu1 %676  ;;  %3895 = vmatmul.mubr.msk.f32.vlgmr.msra.gmra.mxu1 %vm145_vm2, %v4370_v21  ;;  %3900 = vmatmul.mubr.msk.f32.vlgmr.msra.gmra.mxu0 %vm145_vm2, %v4378_v23 }
 0x1c1   :  { %3903 = vmatpush3.xpose.msk.msra.mxu1 %vm145_vm2, %v677_v32  ;;  %3904 = vmatprep.mubr.msk.f32.mxu1 %vm4238_vm1, %v4235_v15 }
 0x1c2   :  { %3912 = vmatprep.subr.mxu1 %v4235_v15  ;;  %3909 = vmatprep.mubr.msk.f32.mxu0 %vm4238_vm1, %v4235_v15 }
 0x1c4   :  { %3905 = vmatmul.mubr.msk.f32.vlgmr.msra.gmra.mxu1 %vm145_vm2, %v4384_v24 }
 0x1c5   :  { %3914 = vmatprep.mubr.msk.f32.mxu1 %vm4238_vm1, %v4235_v15 }
 0x211   :  { %v216_v33 = vpop.f32.mrf.mxu1 }
 0x212   :  { %v752_v34 = vsel %vm145_vm2, %v216_v33, -inf }
 0x213   :  { %753 = vmax.xlane.f32.xlu0 %v752_v34  ;;  %v3871_v35 = vpop.f32.mrf.mxu1 }
 0x215   :  { %v292_v36 = vpop.f32.mrf.mxu1 }
 0x216   :  { %v755_v37 = vsel %vm145_vm2, %v292_v36, -inf }
 0x217   :  { %756 = vmax.xlane.f32.xlu1 %v755_v37  ;;  %v3876_v38 = vpop.f32.mrf.mxu1 }
 0x278   :  { %v368_v39 = vpop.f32.mrf.mxu0 }
 0x279   :  { %v758_v40 = vsel %vm145_vm2, %v368_v39, -inf }
 0x27a   :  { %759 = vmax.xlane.f32.xlu0 %v758_v40  ;;  %v3881_v41 = vpop.f32.mrf.mxu0 }
 0x27c   :  { %v444_v42 = vpop.f32.mrf.mxu1  ;;  %v520_v43 = vpop.f32.mrf.mxu0 }
 0x27d   :  { %v761_v44 = vsel %vm145_vm2, %v444_v42, -inf  ;;  %v764_v45 = vsel %vm145_vm2, %v520_v43, -inf }
 0x27e   :  { %v3886_v46 = vpop.f32.mrf.mxu1  ;;  %762 = vmax.xlane.f32.xlu0 %v761_v44  ;;  %765 = vmax.xlane.f32.xlu1 %v764_v45  ;;  %v3891_v47 = vpop.f32.mrf.mxu0 }
 0x280   :  { %v596_v48 = vpop.f32.mrf.mxu1  ;;  %v672_v49 = vpop.f32.mrf.mxu0 }
 0x281   :  { %v767_v50 = vsel %vm145_vm2, %v596_v48, -inf  ;;  %v770_v51 = vsel %vm145_vm2, %v672_v49, -inf }
 0x282   :  { %v3896_v52 = vpop.f32.mrf.mxu1  ;;  %768 = vmax.xlane.f32.xlu0 %v767_v50  ;;  %771 = vmax.xlane.f32.xlu1 %v770_v51  ;;  %v3901_v53 = vpop.f32.mrf.mxu0 }
 0x284   :  { %v748_v54 = vpop.f32.mrf.mxu1 }
 0x285   :  { %v773_v55 = vsel %vm145_vm2, %v748_v54, -inf }
 0x286   :  { %v3906_v56 = vpop.f32.mrf.mxu1  ;;  %774 = vmax.xlane.f32.xlu0 %v773_v55 }
 0x293   :  { %840 = vrot.lane.b32.xlu1 %v4339_v17, %s4241_s11 }
 0x297   :  { %992 = vrot.lane.b32.xlu1 %v4366_v20, %s4241_s11 }
 0x29b   :  { %1068 = vrot.lane.b32.xlu1 %v4372_v22, %s4241_s11 }
 0x29c   :  { %916 = vrot.lane.b32.xlu0 %v4350_v18, %s4241_s11  ;;  %v754_v59 = vpop.xlane.xlu0 %753 }
 0x29d   :  { %v776_v60 = vsub.f32 %v216_v33, %v754_v59 }
 0x29f   :  { %1220 = vrot.lane.b32.xlu1 %v4370_v21, %s4241_s11  ;;  %v784_v62 = vmul.f32 1.442695, %v776_v60 }
 0x2a0   :  { %1144 = vrot.lane.b32.xlu0 %v4364_v19, %s4241_s11  ;;  %v757_v57 = vpop.xlane.xlu1 %756 }
 0x2a1   :  { %v777_v58 = vsub.f32 %v292_v36, %v757_v57 }
 0x2a3   :  { %v786_v61 = vmul.f32 1.442695, %v777_v58 }
 0x2a5   :  { %4133 = vpow2.f32 %v786_v61 }
 0x2a6   :  { %4135 = vpow2.f32 %v784_v62 }
 0x2b2   :  { %v4456_v63 = vpop.eup %4133 }
 0x2b3   :  { %v803_v3 = vsel %vm145_vm2, %v4456_v63, 0.0  ;;  %v4460_v4 = vpop.eup %4135 }
 0x2b4   :  { %v800_v5 = vsel %vm145_vm2, %v4460_v4, 0.0 }
 0x2bf   :  { %804 = vadd.xlane.f32.xlu0 %v803_v3 }
 0x2c3   :  { %801 = vadd.xlane.f32.xlu1 %v800_v5 }
 0x303   :  { %v760_v9 = vpop.xlane.xlu0 %759 }
 0x304   :  { %v778_v13 = vsub.f32 %v368_v39, %v760_v9 }
 0x306   :  { %v788_v16 = vmul.f32 1.442695, %v778_v13 }
 0x307   :  { %v766_v17 = vpop.xlane.xlu1 %765  ;;  %v763_v18 = vpop.xlane.xlu0 %762 }
 0x308   :  { %4137 = vpow2.f32 %v788_v16  ;;  %v780_v19 = vsub.f32 %v520_v43, %v766_v17  ;;  %v779_v20 = vsub.f32 %v444_v42, %v763_v18 }
 0x30a   :  { %v792_v21 = vmul.f32 1.442695, %v780_v19  ;;  %v790_v22 = vmul.f32 1.442695, %v779_v20 }
 0x30b   :  { %v772_v25 = vpop.xlane.xlu1 %771  ;;  %v769_v26 = vpop.xlane.xlu0 %768 }
 0x30c   :  { %4139 = vpow2.f32 %v792_v21  ;;  %v782_v27 = vsub.f32 %v672_v49, %v772_v25  ;;  %v781_v28 = vsub.f32 %v596_v48, %v769_v26 }
 0x30d   :  { %4141 = vpow2.f32 %v790_v22 }
 0x30e   :  { %v796_v29 = vmul.f32 1.442695, %v782_v27  ;;  %v794_v30 = vmul.f32 1.442695, %v781_v28 }
 0x30f   :  { %v841_v31 = vpop.permute.xlu1 %840  ;;  %v775_v32 = vpop.xlane.xlu0 %774 }
 0x310   :  { %4143 = vpow2.f32 %v796_v29  ;;  %v783_v33 = vsub.f32 %v748_v54, %v775_v32  ;;  %3908 = vmatpush3.msra.mxu0 %v841_v31 }
 0x311   :  { %4145 = vpow2.f32 %v794_v30  ;;  %3917 = vmatprep.subr.mxu0 %v4235_v15 }
 0x312   :  { %v798_v34 = vmul.f32 1.442695, %v783_v33 }
 0x313   :  { %v917_v35 = vpop.permute.xlu0 %916  ;;  %v993_v48 = vpop.permute.xlu1 %992 }
 0x314   :  { %4147 = vpow2.f32 %v798_v34  ;;  %3913 = vmatpush3.msra.mxu1 %v917_v35 }
 0x315   :  { %v4138_v36 = vpop.eup %4137  ;;  %3922 = vmatprep.subr.mxu1 %v4235_v15 }
 0x316   :  { %v806_v37 = vsel %vm145_vm2, %v4138_v36, 0.0 }
 0x317   :  { %807 = vadd.xlane.f32.xlu1 %v806_v37  ;;  %v1069_v49 = vpop.permute.xlu1 %1068  ;;  %v1145_v50 = vpop.permute.xlu0 %1144 }
 0x319   :  { %v4140_v38 = vpop.eup %4139 }
 0x31a   :  { %v4142_v39 = vpop.eup %4141  ;;  %v812_v40 = vsel %vm145_vm2, %v4140_v38, 0.0 }
 0x31b   :  { %813 = vadd.xlane.f32.xlu1 %v812_v40  ;;  %v809_v41 = vsel %vm145_vm2, %v4142_v39, 0.0  ;;  %v1221_v51 = vpop.permute.xlu1 %1220 }
 0x31c   :  { %810 = vadd.xlane.f32.xlu0 %v809_v41 }
 0x31d   :  { %v4469_v42 = vpop.eup %4143 }
 0x31e   :  { %v4471_v43 = vpop.eup %4145  ;;  %v818_v44 = vsel %vm145_vm2, %v4469_v42, 0.0 }
 0x31f   :  { %819 = vadd.xlane.f32.xlu1 %v818_v44  ;;  %v815_v45 = vsel %vm145_vm2, %v4471_v43, 0.0 }
 0x320   :  { %816 = vadd.xlane.f32.xlu0 %v815_v45 }
 0x321   :  { %v4477_v46 = vpop.eup %4147 }
 0x322   :  { %v821_v47 = vsel %vm145_vm2, %v4477_v46, 0.0 }
 0x324   :  { %822 = vadd.xlane.f32.xlu0 %v821_v47 }
 0x330   :  { %1372 = vrot.lane.b32.xlu1 %v4384_v24, %s4241_s11 }
 0x334   :  { %1488 = vrot.lane.b32.xlu1 %v4286_v1, %s4242_s12 }
 0x338   :  { %1486 = vrot.lane.b32.xlu1 %v4292_v2, %s4242_s12 }
 0x33a   :  { %1296 = vrot.lane.b32.xlu0 %v4378_v23, %s4241_s11 }
 0x33e   :  { %1490 = vrot.lane.b32.xlu0 %v4281_v0, %s4242_s12 }
 0x348   :  { %v805_v52 = vpop.xlane.xlu0 %804 }
 0x349   :  { %4149 = vrcp.f32 %v805_v52 }
 0x34c   :  { %v802_v53 = vpop.xlane.xlu1 %801 }
 0x34d   :  { %4151 = vrcp.f32 %v802_v53 }
 0x356   :  { %v4150_v54 = vpop.eup %4149 }
 0x357   :  { %v833_v55 = vmul.f32 %v4150_v54, %v4456_v63 }
 0x359   :  { %3915 = vmatmul.mubr.msk.f32.vlgmr.msra.gmra.mxu1 %vm145_vm2, %v833_v55 }
 0x35a   :  { %v4152_v56 = vpop.eup %4151  ;;  %3923 = vmatpush3.msra.mxu1 %v1069_v49  ;;  %3924 = vmatprep.mubr.msk.f32.mxu1 %vm4238_vm1, %v4235_v15 }
 0x35b   :  { %v832_v23 = vmul.f32 %v4152_v56, %v4460_v4  ;;  %3932 = vmatprep.subr.mxu1 %v4235_v15 }
 0x35d   :  { %3910 = vmatmul.mubr.msk.f32.vlgmr.msra.gmra.mxu0 %vm145_vm2, %v832_v23 }
 0x35e   :  { %3918 = vmatpush3.msra.mxu0 %v993_v48  ;;  %3919 = vmatprep.mubr.msk.f32.mxu0 %vm4238_vm1, %v4235_v15 }
 0x35f   :  { %3927 = vmatprep.subr.mxu0 %v4235_v15 }
 0x3a0   :  { %v808_v24 = vpop.xlane.xlu1 %807 }
 0x3a1   :  { %4153 = vrcp.f32 %v808_v24 }
 0x3a4   :  { %v814_v57 = vpop.xlane.xlu1 %813 }
 0x3a5   :  { %4155 = vrcp.f32 %v814_v57  ;;  %v811_v58 = vpop.xlane.xlu0 %810 }
 0x3a6   :  { %4157 = vrcp.f32 %v811_v58 }
 0x3a8   :  { %v820_v59 = vpop.xlane.xlu1 %819 }
 0x3a9   :  { %4159 = vrcp.f32 %v820_v59  ;;  %v817_v60 = vpop.xlane.xlu0 %816 }
 0x3aa   :  { %4161 = vrcp.f32 %v817_v60 }
 0x3ac   :  { %v1373_v17 = vpop.permute.xlu1 %1372 }
 0x3ad   :  { %v823_v61 = vpop.xlane.xlu0 %822 }
 0x3ae   :  { %v4154_v62 = vpop.eup %4153  ;;  %4163 = vrcp.f32 %v823_v61 }
 0x3af   :  { %v834_v63 = vmul.f32 %v4154_v62, %v4138_v36 }
 0x3b0   :  { %v1489_v20 = vpop.permute.xlu1 %1488 }
 0x3b1   :  { %3920 = vmatmul.mubr.msk.f32.vlgmr.msra.gmra.mxu0 %vm145_vm2, %v834_v63  ;;  %v1297_v4 = vpop.permute.xlu0 %1296 }
 0x3b2   :  { %v4156_v1 = vpop.eup %4155  ;;  %3928 = vmatpush3.msra.mxu0 %v1145_v50  ;;  %3929 = vmatprep.mubr.msk.f32.mxu0 %vm4238_vm1, %v4235_v15 }
 0x3b3   :  { %v4158_v0 = vpop.eup %4157  ;;  %3937 = vmatprep.subr.mxu0 %v4235_v15  ;;  %v836_v2 = vmul.f32 %v4156_v1, %v4140_v38 }
 0x3b4   :  { %v835_v3 = vmul.f32 %v4158_v0, %v4142_v39  ;;  %v1487_v22 = vpop.permute.xlu1 %1486 }
 0x3b5   :  { %3930 = vmatmul.mubr.msk.f32.vlgmr.msra.gmra.mxu0 %vm145_vm2, %v836_v2  ;;  %v1491_v21 = vpop.permute.xlu0 %1490 }
 0x3b6   :  { %v4160_v5 = vpop.eup %4159  ;;  %3925 = vmatmul.mubr.msk.f32.vlgmr.msra.gmra.mxu1 %vm145_vm2, %v835_v3  ;;  %3938 = vmatpush3.msra.mxu0 %v1297_v4  ;;  %v33_v4 = vld [vmem:[%s4931_s3 + $0x18] sm:$0xff] }
 0x3b7   :  { %v4162_v9 = vpop.eup %4161  ;;  %3933 = vmatpush3.msra.mxu1 %v1221_v51  ;;  %3934 = vmatprep.mubr.msk.f32.mxu1 %vm4238_vm1, %v4235_v15  ;;  %v838_v13 = vmul.f32 %v4160_v5, %v4469_v42  ;;  %v32_v5 = vld [vmem:[%s4931_s3 + $0x10] sm:$0xff] }
 0x3b8   :  { %3939 = vmatprep.mubr.msk.f32.mxu0 %vm4238_vm1, %v4235_v15  ;;  %3942 = vmatprep.subr.mxu1 %v4235_v15  ;;  %v837_v16 = vmul.f32 %v4162_v9, %v4471_v43 }
 0x3b9   :  { %3940 = vmatmul.mubr.msk.f32.vlgmr.msra.gmra.mxu0 %vm145_vm2, %v838_v13  ;;  %3947 = vmatprep.subr.mxu0 %v1491_v21  ;;  %v31_v13 = vld [vmem:[%s4931_s3 + $0x8] sm:$0xff] }
 0x3ba   :  { %3935 = vmatmul.mubr.msk.f32.vlgmr.msra.gmra.mxu1 %vm145_vm2, %v837_v16  ;;  %3948 = vmatpush3.msra.mxu0 %v1491_v21  ;;  %v30_v16 = vld [vmem:[%s4931_s3] sm:$0xff] }
 0x3bb   :  { %v4164_v18 = vpop.eup %4163  ;;  %3943 = vmatpush3.msra.mxu1 %v1373_v17  ;;  %3944 = vmatprep.mubr.msk.f32.mxu1 %vm4238_vm1, %v4235_v15  ;;  %v41_v17 = vld [vmem:[%s4931_s3 + $0x58] sm:$0xff] }
 0x3bc   :  { %v839_v19 = vmul.f32 %v4164_v18, %v4477_v46  ;;  %3949 = vmatprep.subr.mxu0 %v1489_v20  ;;  %3958 = vmatprep.subr.mxu1 %v33_v4  ;;  %v40_v18 = vld [vmem:[%s4931_s3 + $0x50] sm:$0xff] }
 0x3bd   :  { %3950 = vmatpush3.msra.mxu0 %v1489_v20  ;;  %v39_v20 = vld [vmem:[%s4931_s3 + $0x48] sm:$0xff] }
 0x3be   :  { %3945 = vmatmul.mubr.msk.f32.vlgmr.msra.gmra.mxu1 %vm145_vm2, %v839_v19  ;;  %3951 = vmatprep.subr.mxu0 %v1487_v22  ;;  %v1624_v19 = vsub.s32 2, %v4323_v10 }
 0x3bf   :  { %3952 = vmatpush3.msra.mxu0 %v1487_v22  ;;  %3959 = vmatpush3.msra.mxu1 %v33_v4  ;;  %v38_v22 = vld [vmem:[%s4931_s3 + $0x40] sm:$0xff] }
 0x3c0   :  { %3960 = vmatprep.subr.mxu1 %v32_v5  ;;  %v1625_v21 = vrot.slane %v4329_v12, %v1624_v19 }
 0x3c1   :  { %3961 = vmatpush3.msra.mxu1 %v32_v5 }
 0x3c2   :  { %3962 = vmatprep.subr.mxu1 %v31_v13 }
 0x3c3   :  { %3963 = vmatpush3.msra.mxu1 %v31_v13 }
 0x3c4   :  { %3964 = vmatprep.subr.mxu1 %v30_v16 }
 0x3c5   :  { %3965 = vmatpush3.msra.mxu1 %v30_v16 }
 0x419   :  { %v988_v25 = vpop.f32.mrf.mxu1 }
 0x41b   :  { %v3916_v26 = vpop.f32.mrf.mxu1 }
 0x41d   :  { %v912_v27 = vpop.f32.mrf.mxu0 }
 0x41f   :  { %v3911_v28 = vpop.f32.mrf.mxu0 }
 0x471   :  { %v1064_v29 = vpop.f32.mrf.mxu0 }
 0x473   :  { %v3921_v30 = vpop.f32.mrf.mxu0 }
 0x475   :  { %v1216_v31 = vpop.f32.mrf.mxu0 }
 0x476   :  { %v1140_v32 = vpop.f32.mrf.mxu1  ;;  %1458 = vrot.lane.b32.xlu1 %v1216_v31, %s4243_s13 }
 0x477   :  { %1452 = vrot.lane.b32.xlu0 %v1140_v32, %s4244_s14  ;;  %v3931_v33 = vpop.f32.mrf.mxu0 }
 0x478   :  { %v3926_v34 = vpop.f32.mrf.mxu1 }
 0x479   :  { %v1368_v35 = vpop.f32.mrf.mxu0 }
 0x47a   :  { %v1292_v36 = vpop.f32.mrf.mxu1  ;;  %1466 = vrot.lane.b32.xlu1 %v1368_v35, %s4245_s15 }
 0x47b   :  { %1450 = vrot.lane.b32.xlu0 %v1064_v29, %s4244_s14  ;;  %v3941_v37 = vpop.f32.mrf.mxu0 }
 0x47c   :  { %v3936_v38 = vpop.f32.mrf.mxu1 }
 0x47e   :  { %v1444_v39 = vpop.f32.mrf.mxu1 }
 0x47f   :  { %1460 = vrot.lane.b32.xlu0 %v1292_v36, %s4243_s13  ;;  %1468 = vrot.lane.b32.xlu1 %v1444_v39, %s4245_s15  ;;  %v37_v39 = vld [vmem:[%s4931_s3 + $0x38] sm:$0xff] }
 0x480   :  { %v3946_v40 = vpop.f32.mrf.mxu1 }
 0x481   :  { %v36_v40 = vld [vmem:[%s4931_s3 + $0x30] sm:$0xff] }
 0x483   :  { %1484 = vrot.lane.b32.xlu0 %v4311_v7, %s4242_s12 }
 0x487   :  { %1497 = vrot.lane.b32.xlu0 %v4334_v14, %s4242_s12 }
 0x4e8   :  { %v1459_v41 = vpop.permute.xlu1 %1458 }
 0x4e9   :  { %v1453_v42 = vpop.permute.xlu0 %1452 }
 0x4ea   :  { %v1473_v7 = vsel %vm145_vm2, %v988_v25, %v1453_v42  ;;  %v34_v42 = vld [vmem:[%s4931_s3 + $0x20] sm:$0xff] }
 0x4ec   :  { %v1467_v44 = vpop.permute.xlu1 %1466 }
 0x4ed   :  { %v1451_v43 = vpop.permute.xlu0 %1450 }
 0x4ee   :  { %v1472_v45 = vsel %vm145_vm2, %v912_v27, %v1451_v43 }
 0x4ef   :  { %v1475_v46 = vsel %vm1474_vm3, %v1472_v45, %v1459_v41  ;;  %v35_v41 = vld [vmem:[%s4931_s3 + $0x28] sm:$0xff] }
 0x4f0   :  { %v1478_v47 = vsel %vm1477_vm4, %v1475_v46, %v1467_v44 }
 0x4f1   :  { %3955 = vmatprep.mubr.msk.f32.mxu0 %vm47_vm0, %v1478_v47  ;;  %v1461_v48 = vpop.permute.xlu0 %1460  ;;  %v1469_v49 = vpop.permute.xlu1 %1468 }
 0x4f2   :  { %v1476_v14 = vsel %vm1474_vm3, %v1473_v7, %v1461_v48 }
 0x4f3   :  { %v1479_v51 = vsel %vm1477_vm4, %v1476_v14, %v1469_v49 }
 0x4f5   :  { %v1485_v50 = vpop.permute.xlu0 %1484 }
 0x4f6   :  { %3953 = vmatprep.subr.mxu0 %v1485_v50 }
 0x4f7   :  { %3954 = vmatpush3.msra.mxu0 %v1485_v50 }
 0x4f8   :  { %3956 = vmatmul.mubr.msk.f32.vlgmr.msra.gmra.mxu0 %vm47_vm0, %v1479_v51  ;;  %3969 = vmatprep.subr.mxu0 %v41_v17 }
 0x4f9   :  { %v1498_v52 = vpop.permute.xlu0 %1497  ;;  %3970 = vmatpush3.msra.mxu0 %v41_v17 }
 0x4fa   :  { %3971 = vmatprep.subr.mxu0 %v40_v18 }
 0x4fb   :  { %3972 = vmatpush3.msra.mxu0 %v40_v18 }
 0x4fc   :  { %3973 = vmatprep.subr.mxu0 %v39_v20 }
 0x4fd   :  { %3974 = vmatpush3.msra.mxu0 %v39_v20 }
 0x4fe   :  { %3975 = vmatprep.subr.mxu0 %v38_v22 }
 0x4ff   :  { %3976 = vmatpush3.msra.mxu0 %v38_v22 }
 0x500   :  { %3977 = vmatprep.subr.mxu0 %v37_v39 }
 0x501   :  { %3978 = vmatpush3.msra.mxu0 %v37_v39 }
 0x502   :  { %3979 = vmatprep.subr.mxu0 %v36_v40 }
 0x503   :  { %3980 = vmatpush3.msra.mxu0 %v36_v40 }
 0x504   :  { %3981 = vmatprep.subr.mxu0 %v35_v41 }
 0x505   :  { %3982 = vmatpush3.msra.mxu0 %v35_v41 }
 0x506   :  { %3983 = vmatprep.subr.mxu0 %v34_v42 }
 0x507   :  { %3984 = vmatpush3.msra.mxu0 %v34_v42 }
 0x508   :  { %4009 = vmatprep.subr.mxu0 %v4235_v15 }
 0x5b8   :  { %v3957_v53 = vpop.f32.mrf.mxu0 }
 0x5b9   :  { %v1578_v54 = vadd.f32 %v3957_v53, %v1498_v52 }
 0x5ba   :  { %v1572_v55 = vpop.f32.mrf.mxu0 }
 0x5bb   :  { %v1573_v56 = vadd.f32 %v1572_v55, %v1498_v52  ;;  %v1582_v23 = vadd.f32 %v1578_v54, %v4314_v8 }
 0x5bd   :  { %v1586_v24 = vsel %vm47_vm0, %v1582_v23, 0.0  ;;  %v1581_v57 = vadd.f32 %v1573_v56, %v4305_v6  ;;  %v1612_v6 = vsub.s32 1, %v4323_v10 }
 0x5be   :  { %1587 = vadd.xlane.f32.xlu0 %v1586_v24 }
 0x5bf   :  { %v1583_v58 = vsel %vm47_vm0, %v1581_v57, 0.0  ;;  %v4554_v9 = vrot.slane %v4329_v12, %v1612_v6 }
 0x5c0   :  { %1584 = vadd.xlane.f32.xlu1 %v1583_v58 }
 0x647   :  { %v1588_v59 = vpop.xlane.xlu0 %1587 }
 0x648   :  { %v1591_v60 = vmul.f32 0.03125, %v1588_v59 }
 0x649   :  { %v1585_v61 = vpop.xlane.xlu1 %1584 }
 0x64a   :  { %v1593_v62 = vsub.f32 %v1582_v23, %v1591_v60  ;;  %v1590_v63 = vmul.f32 0.03125, %v1585_v61 }
 0x64c   :  { %v1592_v1 = vsub.f32 %v1581_v57, %v1590_v63  ;;  %v1595_v0 = vmul.f32 %v1593_v62, %v1593_v62 }
 0x64e   :  { %v1599_v2 = vsel %vm47_vm0, %v1595_v0, 0.0  ;;  %v1594_v3 = vmul.f32 %v1592_v1, %v1592_v1  ;;  %v4620_v0 = vld [vmem:[%s4930_s2 + $0x30] sm:$0xff] }
 0x64f   :  { %1600 = vadd.xlane.f32.xlu1 %v1599_v2  ;;  %v4627_v2 = vld [vmem:[%s4930_s2 + $0x28] sm:$0xff] }
 0x650   :  { %v1596_v8 = vsel %vm47_vm0, %v1594_v3, 0.0  ;;  %v4633_v3 = vld [vmem:[%s4930_s2 + $0x20] sm:$0xff] }
 0x651   :  { %1597 = vadd.xlane.f32.xlu0 %v1596_v8 }
 0x660   :  { %1710 = vrot.lane.b32.xlu1 %v1625_v21, %s4241_s11 }
 0x667   :  { %1617 = vrot.lane.b32.xlu0 %v4554_v9, %s4240_s10 }
 0x6d8   :  { %v1601_v25 = vpop.xlane.xlu1 %1600 }
 0x6d9   :  { %v1603_v26 = vmul.f32 0.03125, %v1601_v25 }
 0x6da   :  { %v1598_v27 = vpop.xlane.xlu0 %1597 }
 0x6db   :  { %v1605_v28 = vadd.f32 1e-05, %v1603_v26  ;;  %v1602_v29 = vmul.f32 0.03125, %v1598_v27 }
 0x6dc   :  { %v1711_v7 = vpop.permute.xlu1 %1710 }
 0x6dd   :  { %4165 = vrsqrt.f32 %v1605_v28  ;;  %v1604_v30 = vadd.f32 1e-05, %v1602_v29 }
 0x6de   :  { %v1618_v36 = vpop.permute.xlu0 %1617 }
 0x6df   :  { %4167 = vrsqrt.f32 %v1604_v30  ;;  %v4652_v30 = vld [vmem:[%s4932_s4 + $0x4] sm:$0x7] }
 0x6ea   :  { %v4166_v12 = vpop.eup %4165 }
 0x6eb   :  { %v1609_v31 = vmul.f32 %v4166_v12, %v1593_v62  ;;  %v4657_v12 = vrot.slane %v4652_v30, %v45_v11 }
 0x6ec   :  { %v4168_v32 = vpop.eup %4167 }
 0x6ed   :  { %v1608_v33 = vmul.f32 %v4168_v32, %v1592_v1  ;;  %v1615_v34 = vmul.f32 %v4554_v9, %v1609_v31  ;;  %v4609_v1 = vld [vmem:[%s4930_s2 + $0x38] sm:$0xff] }
 0x6ee   :  { %3988 = vmatprep.subr.mxu1 %v4609_v1 }
 0x6ef   :  { %v1614_v35 = vmul.f32 %v4554_v9, %v1608_v33  ;;  %v1621_v38 = vadd.f32 %v1618_v36, %v1615_v34 }
 0x6f1   :  { %v1620_v37 = vadd.f32 %v1618_v36, %v1614_v35 }
 0x6f3   :  { %3966 = vmatprep.mubr.msk.f32.mxu1 %vm47_vm0, %v1620_v37 }
 0x6f4   :  { %3967 = vmatmul.mubr.msk.f32.vlgmr.msra.gmra.mxu1 %vm47_vm0, %v1621_v38 }
 0x6f5   :  { %3989 = vmatpush3.msra.mxu1 %v4609_v1 }
 0x6f6   :  { %3990 = vmatprep.subr.mxu1 %v4620_v0 }
 0x6f7   :  { %3991 = vmatpush3.msra.mxu1 %v4620_v0 }
 0x6f8   :  { %3992 = vmatprep.subr.mxu1 %v4627_v2 }
 0x6f9   :  { %3993 = vmatpush3.msra.mxu1 %v4627_v2 }
 0x6fa   :  { %3994 = vmatprep.subr.mxu1 %v4633_v3 }
 0x6fb   :  { %3995 = vmatpush3.msra.mxu1 %v4633_v3 }
 0x6fc   :  { %3999 = vmatprep.subr.mxu1 %v4235_v15 }
 0x7b4   :  { %v3968_v43 = vpop.f32.mrf.mxu1 }
 0x7b5   :  { %v1704_v44 = vadd.f32 %v3968_v43, %v1625_v21 }
 0x7b6   :  { %v1698_v45 = vpop.f32.mrf.mxu1 }
 0x7b7   :  { %v1699_v46 = vadd.f32 %v1698_v45, %v1625_v21  ;;  %v1708_v48 = vmax.f32 %v1704_v44, 0.0 }
 0x7b9   :  { %v1707_v47 = vmax.f32 %v1699_v46, 0.0 }
 0x7bb   :  { %3985 = vmatprep.mubr.msk.f32.mxu0 %vm1713_vm5, %v1707_v47 }
 0x7bc   :  { %3986 = vmatmul.mubr.msk.f32.vlgmr.msra.gmra.mxu0 %vm1713_vm5, %v1708_v48 }
 0x7bd   :  { %4011 = vmatprep.mubr.msk.f32.mxu0 %vm4238_vm1, %v4235_v15 }
 0x87c   :  { %v3987_v49 = vpop.f32.mrf.mxu0 }
 0x87d   :  { %v1792_v14 = vadd.f32 %v3987_v49, %v1711_v7 }
 0x87e   :  { %v1786_v50 = vpop.f32.mrf.mxu0 }
 0x87f   :  { %v1787_v51 = vadd.f32 %v1786_v50, %v1711_v7  ;;  %v1796_v52 = vadd.f32 %v1792_v14, %v1621_v38 }
 0x881   :  { %v1800_v53 = vsel %vm47_vm0, %v1796_v52, 0.0  ;;  %v1795_v54 = vadd.f32 %v1787_v51, %v1620_v37 }
 0x882   :  { %1801 = vadd.xlane.f32.xlu0 %v1800_v53 }
 0x883   :  { %v1797_v55 = vsel %vm47_vm0, %v1795_v54, 0.0 }
 0x884   :  { %1798 = vadd.xlane.f32.xlu1 %v1797_v55 }
 0x90b   :  { %v1802_v56 = vpop.xlane.xlu0 %1801 }
 0x90c   :  { %v1804_v23 = vmul.f32 0.03125, %v1802_v56 }
 0x90d   :  { %v1799_v24 = vpop.xlane.xlu1 %1798 }
 0x90e   :  { %v1806_v57 = vsub.f32 %v1796_v52, %v1804_v23  ;;  %v1803_v58 = vmul.f32 0.03125, %v1799_v24 }
 0x910   :  { %v1805_v59 = vsub.f32 %v1795_v54, %v1803_v58  ;;  %v1808_v60 = vmul.f32 %v1806_v57, %v1806_v57 }
 0x912   :  { %v1812_v61 = vsel %vm47_vm0, %v1808_v60, 0.0  ;;  %v1807_v62 = vmul.f32 %v1805_v59, %v1805_v59 }
 0x913   :  { %1813 = vadd.xlane.f32.xlu1 %v1812_v61 }
 0x914   :  { %v1809_v63 = vsel %vm47_vm0, %v1807_v62, 0.0 }
 0x915   :  { %1810 = vadd.xlane.f32.xlu0 %v1809_v63 }
 0x924   :  { %1828 = vrot.lane.b32.xlu1 %v4554_v9, %s4242_s12 }
 0x92b   :  { %1823 = vrot.lane.b32.xlu0 %v4554_v9, %s4241_s11 }
 0x99c   :  { %v1814_v8 = vpop.xlane.xlu1 %1813 }
 0x99d   :  { %v1816_v4 = vmul.f32 0.03125, %v1814_v8 }
 0x99e   :  { %v1811_v5 = vpop.xlane.xlu0 %1810 }
 0x99f   :  { %v1818_v9 = vadd.f32 1e-05, %v1816_v4  ;;  %v1815_v13 = vmul.f32 0.03125, %v1811_v5 }
 0x9a0   :  { %v1829_v27 = vpop.permute.xlu1 %1828 }
 0x9a1   :  { %4169 = vrsqrt.f32 %v1818_v9  ;;  %v1817_v16 = vadd.f32 1e-05, %v1815_v13 }
 0x9a2   :  { %v1824_v18 = vpop.permute.xlu0 %1823 }
 0x9a3   :  { %4171 = vrsqrt.f32 %v1817_v16 }
 0x9ae   :  { %v4170_v17 = vpop.eup %4169 }
 0x9af   :  { %v1822_v20 = vmul.f32 %v4170_v17, %v1806_v57 }
 0x9b0   :  { %v4172_v21 = vpop.eup %4171 }
 0x9b1   :  { %v1821_v22 = vmul.f32 %v4172_v21, %v1805_v59  ;;  %v1827_v25 = vmul.f32 %v1824_v18, %v1822_v20 }
 0x9b3   :  { %v1826_v26 = vmul.f32 %v1824_v18, %v1821_v22  ;;  %v4641_v29 = vadd.f32 %v1829_v27, %v1827_v25 }
 0x9b5   :  { %v4639_v28 = vadd.f32 %v1829_v27, %v1826_v26 }
 0x9b7   :  { %3996 = vmatprep.mubr.msk.f32.mxu1 %vm47_vm0, %v4639_v28 }
 0x9b8   :  { %3997 = vmatmul.mubr.msk.f32.vlgmr.msra.gmra.mxu1 %vm47_vm0, %v4641_v29 }
 0x9b9   :  { %4001 = vmatprep.mubr.msk.f32.mxu1 %vm4238_vm1, %v4235_v15 }
 0xa78   :  { %v3998_v31 = vpop.f32.mrf.mxu1 }
 0xa79   :  { %v4660_v32 = vadd.f32 %v3998_v31, %v4657_v12 }
 0xa7a   :  { %v1929_v33 = vpop.f32.mrf.mxu1 }
 0xa7b   :  { %v4663_v34 = vadd.f32 %v1929_v33, %v4657_v12  ;;  %1942 = vrot.lane.b32.xlu0 %v4660_v32, %s4237_s8 }
 0xa7d   :  { %1940 = vrot.lane.b32.xlu1 %v4663_v34, %s4237_s8 }
 0xa7f   :  { %1946 = vrot.lane.b32.xlu0 %v4660_v32, %s4236_s7 }
 0xa81   :  { %1944 = vrot.lane.b32.xlu1 %v4663_v34, %s4236_s7 }
 0xa83   :  { %1950 = vrot.lane.b32.xlu0 %v4660_v32, %s4239_s9 }
 0xa85   :  { %1948 = vrot.lane.b32.xlu1 %v4663_v34, %s4239_s9 }
 0xa87   :  { %2028 = vrot.lane.b32.xlu0 %v4660_v32, %s4240_s10 }
 0xa89   :  { %1952 = vrot.lane.b32.xlu1 %v4663_v34, %s4240_s10 }
 0xaed   :  { %v4681_v11 = vpop.permute.xlu0 %1942 }
 0xaee   :  { %2180 = vrot.lane.b32.xlu0 %v4681_v11, %s4240_s10 }
 0xaef   :  { %v4685_v35 = vpop.permute.xlu1 %1940 }
 0xaf0   :  { %2104 = vrot.lane.b32.xlu1 %v4685_v35, %s4240_s10 }
 0xaf1   :  { %v4689_v36 = vpop.permute.xlu0 %1946 }
 0xaf2   :  { %2332 = vrot.lane.b32.xlu0 %v4689_v36, %s4240_s10 }
 0xaf3   :  { %v4693_v37 = vpop.permute.xlu1 %1944 }
 0xaf4   :  { %2256 = vrot.lane.b32.xlu1 %v4693_v37, %s4240_s10 }
 0xaf5   :  { %v4697_v38 = vpop.permute.xlu0 %1950 }
 0xaf6   :  { %2484 = vrot.lane.b32.xlu0 %v4697_v38, %s4240_s10 }
 0xaf7   :  { %v4701_v39 = vpop.permute.xlu1 %1948 }
 0xaf8   :  { %2408 = vrot.lane.b32.xlu1 %v4701_v39, %s4240_s10 }
 0xaf9   :  { %v2029_v41 = vpop.permute.xlu0 %2028 }
 0xafb   :  { %v1953_v40 = vpop.permute.xlu1 %1952 }
 0xafc   :  { %4000 = vmatpush3.xpose.msk.msra.mxu1 %vm145_vm2, %v1953_v40 }
 0xafd   :  { %4004 = vmatprep.subr.mxu1 %v4235_v15 }
 0xaff   :  { %4002 = vmatmul.mubr.msk.f32.vlgmr.msra.gmra.mxu1 %vm145_vm2, %v4663_v34 }
 0xb00   :  { %4005 = vmatpush3.xpose.msk.msra.mxu1 %vm145_vm2, %v2029_v41  ;;  %4006 = vmatprep.mubr.msk.f32.mxu1 %vm4238_vm1, %v4235_v15 }
 0xb01   :  { %4014 = vmatprep.subr.mxu1 %v4235_v15 }
 0xb03   :  { %4007 = vmatmul.mubr.msk.f32.vlgmr.msra.gmra.mxu1 %vm145_vm2, %v4660_v32 }
 0xb04   :  { %4016 = vmatprep.mubr.msk.f32.mxu1 %vm4238_vm1, %v4235_v15 }
 0xb60   :  { %v2181_v42 = vpop.permute.xlu0 %2180 }
 0xb61   :  { %4015 = vmatpush3.xpose.msk.msra.mxu1 %vm145_vm2, %v2181_v42 }
 0xb62   :  { %v2105_v43 = vpop.permute.xlu1 %2104  ;;  %4024 = vmatprep.subr.mxu1 %v4235_v15 }
 0xb63   :  { %4010 = vmatpush3.xpose.msk.msra.mxu0 %vm145_vm2, %v2105_v43 }
 0xb64   :  { %v2333_v44 = vpop.permute.xlu0 %2332  ;;  %4017 = vmatmul.mubr.msk.f32.vlgmr.msra.gmra.mxu1 %vm145_vm2, %v4681_v11  ;;  %4019 = vmatprep.subr.mxu0 %v4235_v15 }
 0xb65   :  { %4025 = vmatpush3.xpose.msk.msra.mxu1 %vm145_vm2, %v2333_v44  ;;  %4026 = vmatprep.mubr.msk.f32.mxu1 %vm4238_vm1, %v4235_v15 }
 0xb66   :  { %4012 = vmatmul.mubr.msk.f32.vlgmr.msra.gmra.mxu0 %vm145_vm2, %v4685_v35  ;;  %v2257_v45 = vpop.permute.xlu1 %2256  ;;  %4034 = vmatprep.subr.mxu1 %v4235_v15 }
 0xb67   :  { %4020 = vmatpush3.xpose.msk.msra.mxu0 %vm145_vm2, %v2257_v45  ;;  %4021 = vmatprep.mubr.msk.f32.mxu0 %vm4238_vm1, %v4235_v15 }
 0xb68   :  { %v2485_v46 = vpop.permute.xlu0 %2484  ;;  %4027 = vmatmul.mubr.msk.f32.vlgmr.msra.gmra.mxu1 %vm145_vm2, %v4689_v36  ;;  %4029 = vmatprep.subr.mxu0 %v4235_v15 }
 0xb69   :  { %4035 = vmatpush3.xpose.msk.msra.mxu1 %vm145_vm2, %v2485_v46  ;;  %4036 = vmatprep.mubr.msk.f32.mxu1 %vm4238_vm1, %v4235_v15 }
 0xb6a   :  { %4022 = vmatmul.mubr.msk.f32.vlgmr.msra.gmra.mxu0 %vm145_vm2, %v4693_v37  ;;  %v2409_v47 = vpop.permute.xlu1 %2408  ;;  %4044 = vmatprep.subr.mxu1 %v4235_v15 }
 0xb6b   :  { %4030 = vmatpush3.xpose.msk.msra.mxu0 %vm145_vm2, %v2409_v47  ;;  %4031 = vmatprep.mubr.msk.f32.mxu0 %vm4238_vm1, %v4235_v15 }
 0xb6c   :  { %4037 = vmatmul.mubr.msk.f32.vlgmr.msra.gmra.mxu1 %vm145_vm2, %v4697_v38  ;;  %4039 = vmatprep.subr.mxu0 %v4235_v15 }
 0xb6d   :  { %4046 = vmatprep.mubr.msk.f32.mxu1 %vm4238_vm1, %v4235_v15 }
 0xb6e   :  { %4032 = vmatmul.mubr.msk.f32.vlgmr.msra.gmra.mxu0 %vm145_vm2, %v4701_v39 }
 0xb6f   :  { %4041 = vmatprep.mubr.msk.f32.mxu0 %vm4238_vm1, %v4235_v15 }
 0xbbf   :  { %v2024_v48 = vpop.f32.mrf.mxu1 }
 0xbc0   :  { %v2560_v7 = vsel %vm145_vm2, %v2024_v48, -inf }
 0xbc1   :  { %2561 = vmax.xlane.f32.xlu1 %v2560_v7  ;;  %v4003_v49 = vpop.f32.mrf.mxu1 }
 0xbc3   :  { %v2100_v14 = vpop.f32.mrf.mxu1 }
 0xbc4   :  { %v2563_v50 = vsel %vm145_vm2, %v2100_v14, -inf }
 0xbc5   :  { %2564 = vmax.xlane.f32.xlu0 %v2563_v50  ;;  %v4008_v51 = vpop.f32.mrf.mxu1 }
 0xc24   :  { %v2252_v52 = vpop.f32.mrf.mxu1 }
 0xc25   :  { %v2569_v53 = vsel %vm145_vm2, %v2252_v52, -inf }
 0xc26   :  { %2570 = vmax.xlane.f32.xlu1 %v2569_v53  ;;  %v2176_v54 = vpop.f32.mrf.mxu0  ;;  %v4018_v55 = vpop.f32.mrf.mxu1 }
 0xc27   :  { %v2566_v56 = vsel %vm145_vm2, %v2176_v54, -inf }
 0xc28   :  { %v2404_v23 = vpop.f32.mrf.mxu1  ;;  %2567 = vmax.xlane.f32.xlu0 %v2566_v56  ;;  %v4013_v24 = vpop.f32.mrf.mxu0 }
 0xc29   :  { %v2575_v57 = vsel %vm145_vm2, %v2404_v23, -inf }
 0xc2a   :  { %2576 = vmax.xlane.f32.xlu1 %v2575_v57  ;;  %v2328_v58 = vpop.f32.mrf.mxu0  ;;  %v4028_v59 = vpop.f32.mrf.mxu1 }
 0xc2b   :  { %v2572_v60 = vsel %vm145_vm2, %v2328_v58, -inf }
 0xc2c   :  { %v2556_v61 = vpop.f32.mrf.mxu1  ;;  %2573 = vmax.xlane.f32.xlu0 %v2572_v60  ;;  %v4023_v62 = vpop.f32.mrf.mxu0 }
 0xc2d   :  { %v2581_v63 = vsel %vm145_vm2, %v2556_v61, -inf }
 0xc2e   :  { %2582 = vmax.xlane.f32.xlu1 %v2581_v63  ;;  %v2480_v8 = vpop.f32.mrf.mxu0  ;;  %v4038_v4 = vpop.f32.mrf.mxu1 }
 0xc2f   :  { %v2578_v5 = vsel %vm145_vm2, %v2480_v8, -inf }
 0xc30   :  { %2579 = vmax.xlane.f32.xlu0 %v2578_v5  ;;  %v4033_v9 = vpop.f32.mrf.mxu0 }
 0xc3f   :  { %2724 = vrot.lane.b32.xlu1 %v4660_v32, %s4241_s11 }
 0xc43   :  { %2800 = vrot.lane.b32.xlu1 %v4685_v35, %s4241_s11 }
 0xc46   :  { %2648 = vrot.lane.b32.xlu0 %v4663_v34, %s4241_s11 }
 0xc47   :  { %2952 = vrot.lane.b32.xlu1 %v4693_v37, %s4241_s11 }
 0xc4a   :  { %2876 = vrot.lane.b32.xlu0 %v4681_v11, %s4241_s11  ;;  %v2562_v16 = vpop.xlane.xlu1 %2561 }
 0xc4b   :  { %v2584_v18 = vsub.f32 %v2024_v48, %v2562_v16 }
 0xc4d   :  { %v2592_v21 = vmul.f32 1.442695, %v2584_v18 }
 0xc4e   :  { %3028 = vrot.lane.b32.xlu0 %v4689_v36, %s4241_s11  ;;  %v2565_v13 = vpop.xlane.xlu0 %2564 }
 0xc4f   :  { %v2585_v17 = vsub.f32 %v2100_v14, %v2565_v13 }
 0xc51   :  { %v2594_v20 = vmul.f32 1.442695, %v2585_v17 }
 0xc53   :  { %4173 = vpow2.f32 %v2594_v20 }
 0xc54   :  { %4175 = vpow2.f32 %v2592_v21 }
 0xc60   :  { %v4773_v22 = vpop.eup %4173 }
 0xc61   :  { %v4775_v25 = vpop.eup %4175  ;;  %v2611_v26 = vsel %vm145_vm2, %v4773_v22, 0.0 }
 0xc62   :  { %v2608_v27 = vsel %vm145_vm2, %v4775_v25, 0.0 }
 0xc6b   :  { %2612 = vadd.xlane.f32.xlu1 %v2611_v26 }
 0xc6d   :  { %2609 = vadd.xlane.f32.xlu0 %v2608_v27 }
 0xcaf   :  { %v2571_v31 = vpop.xlane.xlu1 %2570 }
 0xcb0   :  { %v2587_v32 = vsub.f32 %v2252_v52, %v2571_v31 }
 0xcb1   :  { %v2568_v33 = vpop.xlane.xlu0 %2567 }
 0xcb2   :  { %v2598_v34 = vmul.f32 1.442695, %v2587_v32  ;;  %v2586_v11 = vsub.f32 %v2176_v54, %v2568_v33 }
 0xcb3   :  { %v2577_v35 = vpop.xlane.xlu1 %2576 }
 0xcb4   :  { %4177 = vpow2.f32 %v2598_v34  ;;  %v2596_v36 = vmul.f32 1.442695, %v2586_v11  ;;  %v2589_v37 = vsub.f32 %v2404_v23, %v2577_v35 }
 0xcb5   :  { %v2574_v40 = vpop.xlane.xlu0 %2573 }
 0xcb6   :  { %4179 = vpow2.f32 %v2596_v36  ;;  %v2602_v41 = vmul.f32 1.442695, %v2589_v37  ;;  %v2588_v42 = vsub.f32 %v2328_v58, %v2574_v40 }
 0xcb7   :  { %v2583_v43 = vpop.xlane.xlu1 %2582 }
 0xcb8   :  { %4181 = vpow2.f32 %v2602_v41  ;;  %v2600_v44 = vmul.f32 1.442695, %v2588_v42  ;;  %v2591_v45 = vsub.f32 %v2556_v61, %v2583_v43 }
 0xcb9   :  { %v2580_v46 = vpop.xlane.xlu0 %2579 }
 0xcba   :  { %4183 = vpow2.f32 %v2600_v44  ;;  %v2606_v47 = vmul.f32 1.442695, %v2591_v45  ;;  %v2590_v48 = vsub.f32 %v2480_v8, %v2580_v46 }
 0xcbb   :  { %v2725_v7 = vpop.permute.xlu1 %2724 }
 0xcbc   :  { %4185 = vpow2.f32 %v2606_v47  ;;  %v2604_v49 = vmul.f32 1.442695, %v2590_v48  ;;  %4045 = vmatpush3.msra.mxu1 %v2725_v7 }
 0xcbd   :  { %v2649_v14 = vpop.permute.xlu0 %2648  ;;  %4054 = vmatprep.subr.mxu1 %v4235_v15 }
 0xcbe   :  { %4187 = vpow2.f32 %v2604_v49  ;;  %4040 = vmatpush3.msra.mxu0 %v2649_v14 }
 0xcbf   :  { %4049 = vmatprep.subr.mxu0 %v4235_v15  ;;  %v2801_v60 = vpop.permute.xlu1 %2800 }
 0xcc1   :  { %v4178_v50 = vpop.eup %4177  ;;  %v2877_v61 = vpop.permute.xlu0 %2876 }
 0xcc2   :  { %v2617_v51 = vsel %vm145_vm2, %v4178_v50, 0.0 }
 0xcc3   :  { %v4180_v52 = vpop.eup %4179  ;;  %2618 = vadd.xlane.f32.xlu1 %v2617_v51  ;;  %v2953_v62 = vpop.permute.xlu1 %2952 }
 0xcc4   :  { %v2614_v53 = vsel %vm145_vm2, %v4180_v52, 0.0 }
 0xcc5   :  { %v4182_v54 = vpop.eup %4181  ;;  %2615 = vadd.xlane.f32.xlu0 %v2614_v53  ;;  %v3029_v63 = vpop.permute.xlu0 %3028 }
 0xcc6   :  { %v2623_v55 = vsel %vm145_vm2, %v4182_v54, 0.0 }
 0xcc7   :  { %v4786_v56 = vpop.eup %4183  ;;  %2624 = vadd.xlane.f32.xlu1 %v2623_v55 }
 0xcc8   :  { %v2620_v23 = vsel %vm145_vm2, %v4786_v56, 0.0 }
 0xcc9   :  { %v4790_v24 = vpop.eup %4185  ;;  %2621 = vadd.xlane.f32.xlu0 %v2620_v23 }
 0xcca   :  { %v2629_v57 = vsel %vm145_vm2, %v4790_v24, 0.0 }
 0xccb   :  { %v4794_v58 = vpop.eup %4187  ;;  %2630 = vadd.xlane.f32.xlu1 %v2629_v57 }
 0xccc   :  { %v2626_v59 = vsel %vm145_vm2, %v4794_v58, 0.0 }
 0xccd   :  { %2627 = vadd.xlane.f32.xlu0 %v2626_v59 }
 0xcdc   :  { %3104 = vrot.lane.b32.xlu1 %v4701_v39, %s4241_s11 }
 0xce0   :  { %3296 = vrot.lane.b32.xlu1 %v4609_v1, %s4242_s12 }
 0xce3   :  { %3180 = vrot.lane.b32.xlu0 %v4697_v38, %s4241_s11 }
 0xce7   :  { %3294 = vrot.lane.b32.xlu0 %v4620_v0, %s4242_s12 }
 0xceb   :  { %3292 = vrot.lane.b32.xlu0 %v4627_v2, %s4242_s12 }
 0xcf4   :  { %v2613_v8 = vpop.xlane.xlu1 %2612 }
 0xcf5   :  { %4189 = vrcp.f32 %v2613_v8 }
 0xcf6   :  { %v2610_v4 = vpop.xlane.xlu0 %2609 }
 0xcf7   :  { %4191 = vrcp.f32 %v2610_v4 }
 0xd02   :  { %v4190_v39 = vpop.eup %4189 }
 0xd03   :  { %v2641_v1 = vmul.f32 %v4190_v39, %v4773_v22 }
 0xd04   :  { %v4192_v5 = vpop.eup %4191 }
 0xd05   :  { %4047 = vmatmul.mubr.msk.f32.vlgmr.msra.gmra.mxu1 %vm145_vm2, %v2641_v1  ;;  %v2640_v38 = vmul.f32 %v4192_v5, %v4775_v25 }
 0xd06   :  { %4055 = vmatpush3.msra.mxu1 %v2877_v61  ;;  %4056 = vmatprep.mubr.msk.f32.mxu1 %vm4238_vm1, %v4235_v15 }
 0xd07   :  { %4042 = vmatmul.mubr.msk.f32.vlgmr.msra.gmra.mxu0 %vm145_vm2, %v2640_v38  ;;  %4064 = vmatprep.subr.mxu1 %v4235_v15 }
 0xd08   :  { %4050 = vmatpush3.msra.mxu0 %v2801_v60  ;;  %4051 = vmatprep.mubr.msk.f32.mxu0 %vm4238_vm1, %v4235_v15 }
 0xd09   :  { %4059 = vmatprep.subr.mxu0 %v4235_v15 }
 0xd4c   :  { %v2619_v0 = vpop.xlane.xlu1 %2618 }
 0xd4d   :  { %4193 = vrcp.f32 %v2619_v0 }
 0xd4e   :  { %v2616_v2 = vpop.xlane.xlu0 %2615 }
 0xd4f   :  { %4195 = vrcp.f32 %v2616_v2 }
 0xd50   :  { %v2625_v9 = vpop.xlane.xlu1 %2624 }
 0xd51   :  { %4197 = vrcp.f32 %v2625_v9 }
 0xd52   :  { %v2622_v13 = vpop.xlane.xlu0 %2621 }
 0xd53   :  { %4199 = vrcp.f32 %v2622_v13  ;;  %v4862_v13 = vrot.slane %v4652_v30, %v1612_v6  ;;  %v3694_v6 = vld [vmem:[%s4931_s3 + $0x78] sm:$0xff] }
 0xd54   :  { %v2631_v16 = vpop.xlane.xlu1 %2630 }
 0xd55   :  { %4201 = vrcp.f32 %v2631_v16 }
 0xd56   :  { %v2628_v17 = vpop.xlane.xlu0 %2627 }
 0xd57   :  { %4203 = vrcp.f32 %v2628_v17 }
 0xd58   :  { %v3105_v34 = vpop.permute.xlu1 %3104 }
 0xd5a   :  { %v4194_v18 = vpop.eup %4193  ;;  %v3181_v31 = vpop.permute.xlu0 %3180 }
 0xd5b   :  { %v2643_v20 = vmul.f32 %v4194_v18, %v4178_v50 }
 0xd5c   :  { %v4196_v21 = vpop.eup %4195  ;;  %v3297_v37 = vpop.permute.xlu1 %3296 }
 0xd5d   :  { %4057 = vmatmul.mubr.msk.f32.vlgmr.msra.gmra.mxu1 %vm145_vm2, %v2643_v20  ;;  %v2642_v22 = vmul.f32 %v4196_v21, %v4180_v52 }
 0xd5e   :  { %v4198_v25 = vpop.eup %4197  ;;  %4065 = vmatpush3.msra.mxu1 %v3029_v63  ;;  %4066 = vmatprep.mubr.msk.f32.mxu1 %vm4238_vm1, %v4235_v15  ;;  %v3295_v40 = vpop.permute.xlu0 %3294 }
 0xd5f   :  { %4052 = vmatmul.mubr.msk.f32.vlgmr.msra.gmra.mxu0 %vm145_vm2, %v2642_v22  ;;  %4074 = vmatprep.subr.mxu1 %v4235_v15  ;;  %v2645_v26 = vmul.f32 %v4198_v25, %v4182_v54 }
 0xd60   :  { %v4200_v27 = vpop.eup %4199  ;;  %4060 = vmatpush3.msra.mxu0 %v2953_v62  ;;  %4061 = vmatprep.mubr.msk.f32.mxu0 %vm4238_vm1, %v4235_v15 }
 0xd61   :  { %4067 = vmatmul.mubr.msk.f32.vlgmr.msra.gmra.mxu1 %vm145_vm2, %v2645_v26  ;;  %4069 = vmatprep.subr.mxu0 %v4235_v15  ;;  %v2644_v32 = vmul.f32 %v4200_v27, %v4786_v56  ;;  %v3693_v27 = vld [vmem:[%s4931_s3 + $0x70] sm:$0xff] }
 0xd62   :  { %v4202_v33 = vpop.eup %4201  ;;  %4075 = vmatpush3.msra.mxu1 %v3181_v31  ;;  %4076 = vmatprep.mubr.msk.f32.mxu1 %vm4238_vm1, %v4235_v15  ;;  %v3293_v45 = vpop.permute.xlu0 %3292  ;;  %v3692_v31 = vld [vmem:[%s4931_s3 + $0x68] sm:$0xff] }
 0xd63   :  { %4062 = vmatmul.mubr.msk.f32.vlgmr.msra.gmra.mxu0 %vm145_vm2, %v2644_v32  ;;  %v2647_v11 = vmul.f32 %v4202_v33, %v4790_v24  ;;  %4090 = vmatprep.subr.mxu1 %v3694_v6  ;;  %v3691_v32 = vld [vmem:[%s4931_s3 + $0x60] sm:$0xff]  ;;  %v3702_v33 = vld [vmem:[%s4931_s3 + $0xb8] sm:$0xff] }
 0xd64   :  { %v4204_v35 = vpop.eup %4203  ;;  %4070 = vmatpush3.msra.mxu0 %v3105_v34  ;;  %4071 = vmatprep.mubr.msk.f32.mxu0 %vm4238_vm1, %v4235_v15  ;;  %v3701_v34 = vld [vmem:[%s4931_s3 + $0xb0] sm:$0xff] }
 0xd65   :  { %4077 = vmatmul.mubr.msk.f32.vlgmr.msra.gmra.mxu1 %vm145_vm2, %v2647_v11  ;;  %v2646_v36 = vmul.f32 %v4204_v35, %v4794_v58  ;;  %4079 = vmatprep.subr.mxu0 %v3297_v37  ;;  %v3430_v11 = vrot.slane %v4652_v30, %v1624_v19  ;;  %v3700_v35 = vld [vmem:[%s4931_s3 + $0xa8] sm:$0xff] }
 0xd66   :  { %4091 = vmatpush3.msra.mxu1 %v3694_v6 }
 0xd67   :  { %4072 = vmatmul.mubr.msk.f32.vlgmr.msra.gmra.mxu0 %vm145_vm2, %v2646_v36  ;;  %4092 = vmatprep.subr.mxu1 %v3693_v27  ;;  %v3699_v36 = vld [vmem:[%s4931_s3 + $0xa0] sm:$0xff] }
 0xd68   :  { %4080 = vmatpush3.msra.mxu0 %v3297_v37  ;;  %4093 = vmatpush3.msra.mxu1 %v3693_v27 }
 0xd69   :  { %4081 = vmatprep.subr.mxu0 %v3295_v40  ;;  %4094 = vmatprep.subr.mxu1 %v3692_v31 }
 0xd6a   :  { %4082 = vmatpush3.msra.mxu0 %v3295_v40  ;;  %4095 = vmatpush3.msra.mxu1 %v3692_v31 }
 0xd6b   :  { %4083 = vmatprep.subr.mxu0 %v3293_v45  ;;  %4096 = vmatprep.subr.mxu1 %v3691_v32 }
 0xd6c   :  { %4084 = vmatpush3.msra.mxu0 %v3293_v45  ;;  %4097 = vmatpush3.msra.mxu1 %v3691_v32 }
 0xdc5   :  { %v2796_v41 = vpop.f32.mrf.mxu1 }
 0xdc7   :  { %v2720_v42 = vpop.f32.mrf.mxu0  ;;  %v4048_v43 = vpop.f32.mrf.mxu1 }
 0xdc9   :  { %v4043_v44 = vpop.f32.mrf.mxu0 }
 0xe1d   :  { %v2948_v15 = vpop.f32.mrf.mxu1 }
 0xe1e   :  { %3260 = vrot.lane.b32.xlu1 %v2948_v15, %s4244_s14 }
 0xe1f   :  { %v2872_v46 = vpop.f32.mrf.mxu0  ;;  %v4058_v47 = vpop.f32.mrf.mxu1 }
 0xe21   :  { %v4053_v48 = vpop.f32.mrf.mxu0  ;;  %v3100_v7 = vpop.f32.mrf.mxu1 }
 0xe22   :  { %3258 = vrot.lane.b32.xlu1 %v2872_v46, %s4244_s14 }
 0xe23   :  { %v3024_v49 = vpop.f32.mrf.mxu0  ;;  %v4068_v14 = vpop.f32.mrf.mxu1 }
 0xe24   :  { %3266 = vrot.lane.b32.xlu0 %v3024_v49, %s4243_s13  ;;  %v3698_v49 = vld [vmem:[%s4931_s3 + $0x98] sm:$0xff]  ;;  %v3697_v14 = vld [vmem:[%s4931_s3 + $0x90] sm:$0xff] }
 0xe25   :  { %v4063_v50 = vpop.f32.mrf.mxu0  ;;  %v3252_v51 = vpop.f32.mrf.mxu1 }
 0xe26   :  { %3268 = vrot.lane.b32.xlu1 %v3100_v7, %s4243_s13  ;;  %v3696_v50 = vld [vmem:[%s4931_s3 + $0x88] sm:$0xff] }
 0xe27   :  { %v3176_v52 = vpop.f32.mrf.mxu0  ;;  %v4078_v53 = vpop.f32.mrf.mxu1 }
 0xe28   :  { %3274 = vrot.lane.b32.xlu0 %v3176_v52, %s4245_s15 }
 0xe29   :  { %v4073_v54 = vpop.f32.mrf.mxu0 }
 0xe2a   :  { %3290 = vrot.lane.b32.xlu1 %v4633_v3, %s4242_s12 }
 0xe2c   :  { %3276 = vrot.lane.b32.xlu0 %v3252_v51, %s4245_s15  ;;  %v3695_v51 = vld [vmem:[%s4931_s3 + $0x80] sm:$0xff]  ;;  %s4246_s3 = smov [#allocation2]  }
 0xe2e   :  { %3303 = vrot.lane.b32.xlu1 %v4657_v12, %s4242_s12 }
 0xe90   :  { %v3261_v55 = vpop.permute.xlu1 %3260 }
 0xe91   :  { %v3281_v3 = vsel %vm145_vm2, %v2796_v41, %v3261_v55 }
 0xe94   :  { %v3259_v56 = vpop.permute.xlu1 %3258 }
 0xe95   :  { %v3280_v24 = vsel %vm145_vm2, %v2720_v42, %v3259_v56 }
 0xe96   :  { %v3267_v23 = vpop.permute.xlu0 %3266 }
 0xe97   :  { %v3282_v58 = vsel %vm1474_vm3, %v3280_v24, %v3267_v23 }
 0xe98   :  { %v3269_v57 = vpop.permute.xlu1 %3268 }
 0xe99   :  { %v3283_v62 = vsel %vm1474_vm3, %v3281_v3, %v3269_v57 }
 0xe9a   :  { %v3275_v59 = vpop.permute.xlu0 %3274 }
 0xe9b   :  { %v3284_v60 = vsel %vm1477_vm4, %v3282_v58, %v3275_v59 }
 0xe9c   :  { %4087 = vmatprep.mubr.msk.f32.mxu0 %vm47_vm0, %v3284_v60  ;;  %v3291_v61 = vpop.permute.xlu1 %3290 }
 0xe9d   :  { %4085 = vmatprep.subr.mxu0 %v3291_v61 }
 0xe9e   :  { %v3277_v12 = vpop.permute.xlu0 %3276  ;;  %4086 = vmatpush3.msra.mxu0 %v3291_v61 }
 0xe9f   :  { %v3285_v63 = vsel %vm1477_vm4, %v3283_v62, %v3277_v12  ;;  %4101 = vmatprep.subr.mxu0 %v3702_v33 }
 0xea0   :  { %4088 = vmatmul.mubr.msk.f32.vlgmr.msra.gmra.mxu0 %vm47_vm0, %v3285_v63  ;;  %v3304_v8 = vpop.permute.xlu1 %3303 }
 0xea1   :  { %4102 = vmatpush3.msra.mxu0 %v3702_v33 }
 0xea2   :  { %4103 = vmatprep.subr.mxu0 %v3701_v34 }
 0xea3   :  { %4104 = vmatpush3.msra.mxu0 %v3701_v34 }
 0xea4   :  { %4105 = vmatprep.subr.mxu0 %v3700_v35 }
 0xea5   :  { %4106 = vmatpush3.msra.mxu0 %v3700_v35 }
 0xea6   :  { %4107 = vmatprep.subr.mxu0 %v3699_v36 }
 0xea7   :  { %4108 = vmatpush3.msra.mxu0 %v3699_v36 }
 0xea8   :  { %4109 = vmatprep.subr.mxu0 %v3698_v49 }
 0xea9   :  { %4110 = vmatpush3.msra.mxu0 %v3698_v49 }
 0xeaa   :  { %4111 = vmatprep.subr.mxu0 %v3697_v14 }
 0xeab   :  { %4112 = vmatpush3.msra.mxu0 %v3697_v14 }
 0xeac   :  { %4113 = vmatprep.subr.mxu0 %v3696_v50 }
 0xead   :  { %4114 = vmatpush3.msra.mxu0 %v3696_v50 }
 0xeae   :  { %4115 = vmatprep.subr.mxu0 %v3695_v51 }
 0xeaf   :  { %4116 = vmatpush3.msra.mxu0 %v3695_v51 }
 0xf60   :  { %v4089_v4 = vpop.f32.mrf.mxu0 }
 0xf61   :  { %v3384_v39 = vadd.f32 %v4089_v4, %v3304_v8 }
 0xf62   :  { %v3378_v1 = vpop.f32.mrf.mxu0 }
 0xf63   :  { %v3379_v5 = vadd.f32 %v3378_v1, %v3304_v8  ;;  %v3388_v38 = vadd.f32 %v3384_v39, %v4641_v29 }
 0xf65   :  { %v3387_v0 = vadd.f32 %v3379_v5, %v4639_v28  ;;  %v3392_v2 = vsel %vm47_vm0, %v3388_v38, 0.0 }
 0xf66   :  { %3393 = vadd.xlane.f32.xlu1 %v3392_v2 }
 0xf67   :  { %v3389_v9 = vsel %vm47_vm0, %v3387_v0, 0.0 }
 0xf68   :  { %3390 = vadd.xlane.f32.xlu0 %v3389_v9 }
 0xf77   :  { %3422 = vrot.lane.b32.xlu1 %v4862_v13, %s4240_s10 }
 0xfef   :  { %v3394_v16 = vpop.xlane.xlu1 %3393 }
 0xff0   :  { %v3396_v17 = vmul.f32 0.03125, %v3394_v16 }
 0xff1   :  { %v3391_v18 = vpop.xlane.xlu0 %3390 }
 0xff2   :  { %v3395_v29 = vmul.f32 0.03125, %v3391_v18  ;;  %v3398_v20 = vsub.f32 %v3388_v38, %v3396_v17 }
 0xff3   :  { %v3423_v44 = vpop.permute.xlu1 %3422 }
 0xff4   :  { %v3397_v28 = vsub.f32 %v3387_v0, %v3395_v29  ;;  %v3400_v25 = vmul.f32 %v3398_v20, %v3398_v20 }
 0xff6   :  { %v3399_v21 = vmul.f32 %v3397_v28, %v3397_v28  ;;  %v3404_v26 = vsel %vm47_vm0, %v3400_v25, 0.0 }
 0xff8   :  { %v3401_v22 = vsel %vm47_vm0, %v3399_v21, 0.0 }
 0xff9   :  { %3402 = vadd.xlane.f32.xlu0 %v3401_v22 }
 0xffd   :  { %3405 = vadd.xlane.f32.xlu0 %v3404_v26 }
0x1013   :  { %3515 = vrot.lane.b32.xlu0 %v3430_v11, %s4241_s11 }
0x1082   :  { %v3403_v10 = vpop.xlane.xlu0 %3402 }
0x1083   :  { %v3407_v19 = vmul.f32 0.03125, %v3403_v10 }
0x1085   :  { %v3409_v30 = vadd.f32 1e-05, %v3407_v19 }
0x1086   :  { %v3406_v37 = vpop.xlane.xlu0 %3405 }
0x1087   :  { %4205 = vrsqrt.f32 %v3409_v30  ;;  %v3408_v40 = vmul.f32 0.03125, %v3406_v37 }
0x1089   :  { %v3410_v41 = vadd.f32 1e-05, %v3408_v40 }
0x108a   :  { %v3516_v24 = vpop.permute.xlu0 %3515 }
0x108b   :  { %4207 = vrsqrt.f32 %v3410_v41 }
0x1094   :  { %v4206_v42 = vpop.eup %4205 }
0x1095   :  { %v3413_v43 = vmul.f32 %v4206_v42, %v3397_v28 }
0x1097   :  { %v3419_v45 = vmul.f32 %v4862_v13, %v3413_v43 }
0x1098   :  { %v4208_v15 = vpop.eup %4207 }
0x1099   :  { %v3414_v46 = vmul.f32 %v4208_v15, %v3398_v20  ;;  %v3425_v47 = vadd.f32 %v3423_v44, %v3419_v45 }
0x109b   :  { %v3420_v48 = vmul.f32 %v4862_v13, %v3414_v46  ;;  %4098 = vmatprep.mubr.msk.f32.mxu1 %vm47_vm0, %v3425_v47 }
0x109d   :  { %v3426_v7 = vadd.f32 %v3423_v44, %v3420_v48 }
0x109f   :  { %4099 = vmatmul.mubr.msk.f32.vlgmr.msra.gmra.mxu1 %vm47_vm0, %v3426_v7 }
0x115f   :  { %v4100_v52 = vpop.f32.mrf.mxu1 }
0x1160   :  { %v3509_v53 = vadd.f32 %v4100_v52, %v3430_v11 }
0x1161   :  { %v3503_v54 = vpop.f32.mrf.mxu1 }
0x1162   :  { %v3504_v55 = vadd.f32 %v3503_v54, %v3430_v11  ;;  %v3513_v23 = vmax.f32 %v3509_v53, 0.0 }
0x1164   :  { %v3512_v56 = vmax.f32 %v3504_v55, 0.0 }
0x1166   :  { %4117 = vmatprep.mubr.msk.f32.mxu0 %vm1713_vm5, %v3512_v56 }
0x1167   :  { %4118 = vmatmul.mubr.msk.f32.vlgmr.msra.gmra.mxu0 %vm1713_vm5, %v3513_v23 }
0x1227   :  { %v4119_v57 = vpop.f32.mrf.mxu0 }
0x1228   :  { %v3596_v58 = vadd.f32 %v4119_v57, %v3516_v24 }
0x1229   :  { %v3590_v59 = vpop.f32.mrf.mxu0 }
0x122a   :  { %v3591_v60 = vadd.f32 %v3590_v59, %v3516_v24  ;;  %v3600_v61 = vadd.f32 %v3596_v58, %v3426_v7 }
0x122c   :  { %v3599_v3 = vadd.f32 %v3591_v60, %v3425_v47  ;;  %v3604_v62 = vsel %vm47_vm0, %v3600_v61, 0.0 }
0x122d   :  { %3605 = vadd.xlane.f32.xlu0 %v3604_v62 }
0x122e   :  { %v3601_v12 = vsel %vm47_vm0, %v3599_v3, 0.0 }
0x122f   :  { %3602 = vadd.xlane.f32.xlu1 %v3601_v12 }
0x12b6   :  { %v3606_v63 = vpop.xlane.xlu0 %3605 }
0x12b7   :  { %v3608_v8 = vmul.f32 0.03125, %v3606_v63 }
0x12b8   :  { %v3603_v4 = vpop.xlane.xlu1 %3602 }
0x12b9   :  { %v3610_v39 = vsub.f32 %v3600_v61, %v3608_v8  ;;  %v3607_v1 = vmul.f32 0.03125, %v3603_v4 }
0x12bb   :  { %v3609_v5 = vsub.f32 %v3599_v3, %v3607_v1  ;;  %v3612_v38 = vmul.f32 %v3610_v39, %v3610_v39 }
0x12bd   :  { %v3616_v0 = vsel %vm47_vm0, %v3612_v38, 0.0  ;;  %v3611_v2 = vmul.f32 %v3609_v5, %v3609_v5 }
0x12be   :  { %3617 = vadd.xlane.f32.xlu0 %v3616_v0 }
0x12bf   :  { %v3613_v9 = vsel %vm47_vm0, %v3611_v2, 0.0 }
0x12c0   :  { %3614 = vadd.xlane.f32.xlu1 %v3613_v9 }
0x12d1   :  { %3627 = vrot.lane.b32.xlu1 %v4862_v13, %s4241_s11  ;;  %s3644_s11 = sshll.u32 %s4246_s3, 4  ;;  %s3645_s11 = int_to_ptr.vmem [resolvable:$true] %s3644_s11 }
0x12d2   :  { %p4218_p1 = scmp.lt.s32.totalorder %s3645_s11, %s3645_s11 }
0x12d4   :  { %3632 = vrot.lane.b32.xlu0 %v4862_v13, %s4242_s12  ;;  %s4213_s12 = scalar_lea.vmem %s3645_s11, 256 }
0x12d5   :  { %p4214_p0 = scmp.ne.s32.totalorder %s3645_s11, %s4213_s12  ;;  %p4219_p2 = scmp.lt.s32.totalorder %s4213_s12, %s4213_s12 }
0x12d7   :  { %p4220_p3 = por %p4219_p2, %p4218_p1 }
0x12d9   :  { %p4221_p4 = pnand %p4220_p3, %p4214_p0 }
0x1347   :  { %v3618_v16 = vpop.xlane.xlu0 %3617 }
0x1348   :  { %v3620_v17 = vmul.f32 0.03125, %v3618_v16 }
0x1349   :  { %v3615_v18 = vpop.xlane.xlu1 %3614 }
0x134a   :  { %v3622_v29 = vadd.f32 1e-05, %v3620_v17  ;;  %v3619_v20 = vmul.f32 0.03125, %v3615_v18 }
0x134b   :  { %v3633_v6 = vpop.permute.xlu0 %3632 }
0x134c   :  { %4209 = vrsqrt.f32 %v3622_v29  ;;  %v3621_v28 = vadd.f32 1e-05, %v3619_v20 }
0x134d   :  { %v3628_v22 = vpop.permute.xlu1 %3627 }
0x134e   :  { %4211 = vrsqrt.f32 %v3621_v28 }
0x1359   :  { %v4210_v21 = vpop.eup %4209 }
0x135a   :  { %v3626_v25 = vmul.f32 %v4210_v21, %v3610_v39 }
0x135b   :  { %v4212_v26 = vpop.eup %4211 }
0x135c   :  { %v3625_v27 = vmul.f32 %v4212_v26, %v3609_v5  ;;  %v3631_v31 = vmul.f32 %v3628_v22, %v3626_v25 }
0x135e   :  { %v3630_v32 = vmul.f32 %v3628_v22, %v3625_v27  ;;  %v3636_v33 = vadd.f32 %v3633_v6, %v3631_v31 }
0x1360   :  { %v3635_v13 = vadd.f32 %v3633_v6, %v3630_v32  ;;  %3638 = vst.msk [vmem:[#allocation2 + $0x8] sm:$0xff] %vm47_vm0, %v3636_v33 }
0x1362   :  { %3637 = vst.msk [vmem:[#allocation2] sm:$0xff] %vm47_vm0, %v3635_v13 }
0x1363   :  { %4224 = shalt.err (!%p4221_p4)
}
0x1364   :  { %s4247_s2 = smov 128  }
0x1365   :  { %3650 = dma.vmem_to_hbm [thread:$0]  %s3645_s11, 256, %s4933_s5, [#allocation3], %s4247_s2, %s4247_s2, %s4244_s14  }
0x1366   :  { %4233 = dma.done.wait [#allocation3], 256  }
0x1367   :  { %4234 = vsyncadd [#allocation3], 4294967040 }
0x1368   :  { %3654 = vsyncpa [#allocation3], 1 }

</bundles_post_ra>
